<compile_context>
chip_gen: v7x
topology: tpu7x:2x2x1
jax: 0.10.0
libtpu: 0.0.40
codegen_flags: <defaults>
</compile_context>

<pallas_src>
import jax
import jax.numpy as jnp
from jax.experimental import pallas as pl
from jax.experimental.pallas import tpu as pltpu

# ----------------------------- model dims (small) ---------------------------
VOCAB_SIZE = 64
EMBED_SIZE = 32
HIDDEN_SIZE = 32
NUM_LAYERS = 1          # kernel implements the num_layers=1 case
BATCH = 2
SEQ_LEN = 8
LANE = 128


def _round_up(n, m):
    return ((n + m - 1) // m) * m


# ------------------------------ fused kernel --------------------------------
def _rnnlm_kernel(ids_ref,            # SMEM (B, T) int32   (scalar prefetch)
                  embed_ref,          # VMEM (V, E)
                  wih_ref,            # VMEM (E, 4H)
                  whh_ref,            # VMEM (H, 4H)
                  b_ref,              # VMEM (1, 4H)
                  wlin_ref,           # VMEM (H, Vpad)
                  blin_ref,           # VMEM (1, Vpad)
                  h0_ref,             # VMEM (B, H)
                  c0_ref,             # VMEM (B, H)
                  logits_ref,         # VMEM (B*T, Vpad)   output
                  hT_ref,             # VMEM (B, H)        output
                  cT_ref,             # VMEM (B, H)        output
                  x_sc,               # VMEM scratch (T*B, E)  gathered embeds
                  hs_sc):             # VMEM scratch (B*T, H)  hidden states
    B, T = ids_ref.shape
    H = h0_ref.shape[-1]

    # ---- 1. embedding gather: x_sc rows are time-major (row = t*B + b) -----
    for t in range(T):
        for b in range(B):
            tok = ids_ref[b, t]
            x_sc[pl.ds(t * B + b, 1), :] = embed_ref[pl.ds(tok, 1), :]

    # ---- 2. input projection for ALL timesteps at once, bias folded in ----
    gates_x = (jnp.dot(x_sc[...], wih_ref[...],
                       preferred_element_type=jnp.float32)
               + b_ref[...])                     # (T*B, 4H), gate order i|f|g|o

    # ---- 3. recurrence (fully unrolled; only h @ W_hh on the serial path) --
    h = h0_ref[...]                              # (B, H)
    c = c0_ref[...]                              # (B, H)
    for t in range(T):
        gates = gates_x[t * B:(t + 1) * B, :] + jnp.dot(
            h, whh_ref[...], preferred_element_type=jnp.float32)  # (B, 4H)
        # full 128-lane activations through the EUP, then cheap slices
        sig = jax.nn.sigmoid(gates)
        th = jnp.tanh(gates)
        i_g = sig[:, 0:H]
        f_g = sig[:, H:2 * H]
        g_g = th[:, 2 * H:3 * H]
        o_g = sig[:, 3 * H:4 * H]
        c = f_g * c + i_g * g_g
        h = o_g * jnp.tanh(c)
        # stash hidden state in batch-major order (row = b*T + t) for Linear
        for b in range(B):
            hs_sc[pl.ds(b * T + t, 1), :] = h[b:b + 1, :]

    hT_ref[...] = h
    cT_ref[...] = c

    # ---- 4. final Linear: one matmul, one lane-dense writeback -------------
    logits_ref[...] = (jnp.dot(hs_sc[...], wlin_ref[...],
                               preferred_element_type=jnp.float32)
                       + blin_ref[...])


def rnnlm_pallas(ids, embed, w_ih, w_hh, lstm_b, w_lin, b_lin, h0, c0):
    """ids: (B,T) int32; h0/c0: (B,H). Returns (logits (B*T,V), hT, cT)."""
    B, T = ids.shape
    V, E = embed.shape
    H = h0.shape[-1]
    G = 4 * H
    Vpad = _round_up(V, LANE)

    # zero-pad output projection so the logits store is lane-dense (×128)
    w_lin_p = jnp.pad(w_lin, ((0, 0), (0, Vpad - V)))
    b_lin_p = jnp.pad(b_lin, ((0, 0), (0, Vpad - V)))

    grid_spec = pltpu.PrefetchScalarGridSpec(
        num_scalar_prefetch=1,                    # token ids -> SMEM
        grid=(1,),                                # single invocation
        in_specs=[
            pl.BlockSpec((V, E), lambda i, _s: (0, 0)),      # embedding table
            pl.BlockSpec((E, G), lambda i, _s: (0, 0)),      # W_ih
            pl.BlockSpec((H, G), lambda i, _s: (0, 0)),      # W_hh
            pl.BlockSpec((1, G), lambda i, _s: (0, 0)),      # lstm bias
            pl.BlockSpec((H, Vpad), lambda i, _s: (0, 0)),   # W_lin (padded)
            pl.BlockSpec((1, Vpad), lambda i, _s: (0, 0)),   # b_lin (padded)
            pl.BlockSpec((B, H), lambda i, _s: (0, 0)),      # h0
            pl.BlockSpec((B, H), lambda i, _s: (0, 0)),      # c0
        ],
        out_specs=[
            pl.BlockSpec((B * T, Vpad), lambda i, _s: (0, 0)),   # logits
            pl.BlockSpec((B, H), lambda i, _s: (0, 0)),          # h_T
            pl.BlockSpec((B, H), lambda i, _s: (0, 0)),          # c_T
        ],
        scratch_shapes=[
            pltpu.VMEM((T * B, E), jnp.float32),   # gathered embeddings
            pltpu.VMEM((B * T, H), jnp.float32),   # hidden states, batch-major
        ],
    )

    out_shapes = (
        jax.ShapeDtypeStruct((B * T, Vpad), jnp.float32),
        jax.ShapeDtypeStruct((B, H), jnp.float32),
        jax.ShapeDtypeStruct((B, H), jnp.float32),
    )

    logits_p, hT, cT = pl.pallas_call(
        _rnnlm_kernel,
        grid_spec=grid_spec,
        out_shape=out_shapes,
        compiler_params=pltpu.CompilerParams(
            dimension_semantics=("arbitrary",)),   # serial recurrence, one TC
    )(ids, embed, w_ih, w_hh, lstm_b, w_lin_p, b_lin_p, h0, c0)

    return logits_p[:, :V], hT, cT


# ------------------------------- full forward --------------------------------
@jax.jit
def rnnlm_forward(params, x_tokens, h0, c0):
    logits, hT, cT = rnnlm_pallas(
        x_tokens, params["embed"], params["w_ih"], params["w_hh"],
        params["lstm_b"], params["w_lin"], params["b_lin"], h0[0], c0[0])
    return logits, (hT[None], cT[None])


# ------------------------------ param init -----------------------------------
def init_params(key):
    ks = jax.random.split(key, 6)
    k_lstm = 1.0 / jnp.sqrt(HIDDEN_SIZE)
    k_lin = 1.0 / jnp.sqrt(HIDDEN_SIZE)
    G = 4 * HIDDEN_SIZE
    # PyTorch: Embedding ~ N(0,1); LSTM / Linear ~ U(-1/sqrt(H), 1/sqrt(H)).
    return {
        "embed": jax.random.normal(ks[0], (VOCAB_SIZE, EMBED_SIZE), jnp.float32),
        # stored transposed relative to PyTorch: (E, 4H) / (H, 4H), gates i|f|g|o
        "w_ih": jax.random.uniform(ks[1], (EMBED_SIZE, G), jnp.float32,
                                   -k_lstm, k_lstm),
        "w_hh": jax.random.uniform(ks[2], (HIDDEN_SIZE, G), jnp.float32,
                                   -k_lstm, k_lstm),
        # b_ih + b_hh folded into one (1, 4H) bias
        "lstm_b": jax.random.uniform(ks[3], (1, G), jnp.float32,
                                     -k_lstm, k_lstm),
        "w_lin": jax.random.uniform(ks[4], (HIDDEN_SIZE, VOCAB_SIZE),
                                    jnp.float32, -k_lin, k_lin),
        "b_lin": jax.random.uniform(ks[5], (1, VOCAB_SIZE), jnp.float32,
                                    -k_lin, k_lin),
    }


# --------------------------- pure-JAX reference -------------------------------
def rnnlm_reference(params, x_tokens, h0, c0):
    emb = params["embed"][x_tokens]                 # (B, T, E)
    H = HIDDEN_SIZE

    def step(carry, x_t):
        h, c = carry
        gates = x_t @ params["w_ih"] + h @ params["w_hh"] + params["lstm_b"]
        i = jax.nn.sigmoid(gates[:, 0:H])
        f = jax.nn.sigmoid(gates[:, H:2 * H])
        g = jnp.tanh(gates[:, 2 * H:3 * H])
        o = jax.nn.sigmoid(gates[:, 3 * H:4 * H])
        c_new = f * c + i * g
        h_new = o * jnp.tanh(c_new)
        return (h_new, c_new), h_new

    (hT, cT), outs = jax.lax.scan(step, (h0[0], c0[0]),
                                  jnp.transpose(emb, (1, 0, 2)))
    out_flat = jnp.transpose(outs, (1, 0, 2)).reshape(-1, H)
    logits = out_flat @ params["w_lin"] + params["b_lin"]
    return logits, (hT[None], cT[None])


# ----------------------------------- main -------------------------------------
if __name__ == "__main__":
    key = jax.random.PRNGKey(0)
    k_p, k_x = jax.random.split(key)

    params = init_params(k_p)
    x_tokens = jax.random.randint(k_x, (BATCH, SEQ_LEN), 0, VOCAB_SIZE,
                                  dtype=jnp.int32)
    h0 = jnp.zeros((NUM_LAYERS, BATCH, HIDDEN_SIZE), jnp.float32)
    c0 = jnp.zeros((NUM_LAYERS, BATCH, HIDDEN_SIZE), jnp.float32)

    logits, (hT, cT) = rnnlm_forward(params, x_tokens, h0, c0)
    jax.block_until_ready((logits, hT, cT))

    # correctness check against the pure-JAX reference
    ref_logits, (ref_h, ref_c) = rnnlm_reference(params, x_tokens, h0, c0)
    assert logits.shape == (BATCH * SEQ_LEN, VOCAB_SIZE)
    assert hT.shape == (NUM_LAYERS, BATCH, HIDDEN_SIZE)
    assert cT.shape == (NUM_LAYERS, BATCH, HIDDEN_SIZE)
    assert jnp.allclose(logits, ref_logits, atol=1e-4, rtol=1e-4)
    assert jnp.allclose(hT, ref_h, atol=1e-5, rtol=1e-5)
    assert jnp.allclose(cT, ref_c, atol=1e-5, rtol=1e-5)

    print("KERNEL_OK")
</pallas_src>

<mosaic_0001>
module attributes {stable_mosaic.version = 11 : i64} {
  func.func @_rnnlm_kernel(%arg0: i32, %arg1: memref<2x8xi32, #tpu.memory_space<smem>>, %arg2: memref<64x32xf32, #tpu.memory_space<vmem>>, %arg3: memref<32x128xf32, #tpu.memory_space<vmem>>, %arg4: memref<32x128xf32, #tpu.memory_space<vmem>>, %arg5: memref<1x128xf32, #tpu.memory_space<vmem>>, %arg6: memref<32x128xf32, #tpu.memory_space<vmem>>, %arg7: memref<1x128xf32, #tpu.memory_space<vmem>>, %arg8: memref<2x32xf32, #tpu.memory_space<vmem>>, %arg9: memref<2x32xf32, #tpu.memory_space<vmem>>, %arg10: memref<16x128xf32, #tpu.memory_space<vmem>>, %arg11: memref<2x32xf32, #tpu.memory_space<vmem>>, %arg12: memref<2x32xf32, #tpu.memory_space<vmem>>, %arg13: memref<16x32xf32, #tpu.memory_space<vmem>>, %arg14: memref<16x32xf32, #tpu.memory_space<vmem>>) attributes {dimension_semantics = [#tpu.dimension_semantics<arbitrary>], iteration_bounds = array<i64: 1>, scalar_prefetch = 1 : i64, scratch_operands = 2 : i64, tpu.core_type = #tpu.core_type<tc>, window_params = [{pipeline_mode = #tpu.pipeline_mode<synchronous>, transform_indices = @transform_0, window_bounds = array<i64: 64, 32>}, {pipeline_mode = #tpu.pipeline_mode<synchronous>, transform_indices = @transform_1, window_bounds = array<i64: 32, 128>}, {pipeline_mode = #tpu.pipeline_mode<synchronous>, transform_indices = @transform_2, window_bounds = array<i64: 32, 128>}, {pipeline_mode = #tpu.pipeline_mode<synchronous>, transform_indices = @transform_3, window_bounds = array<i64: 1, 128>}, {pipeline_mode = #tpu.pipeline_mode<synchronous>, transform_indices = @transform_4, window_bounds = array<i64: 32, 128>}, {pipeline_mode = #tpu.pipeline_mode<synchronous>, transform_indices = @transform_5, window_bounds = array<i64: 1, 128>}, {pipeline_mode = #tpu.pipeline_mode<synchronous>, transform_indices = @transform_6, window_bounds = array<i64: 2, 32>}, {pipeline_mode = #tpu.pipeline_mode<synchronous>, transform_indices = @transform_7, window_bounds = array<i64: 2, 32>}, {pipeline_mode = #tpu.pipeline_mode<synchronous>, transform_indices = @transform_8, window_bounds = array<i64: 16, 128>}, {pipeline_mode = #tpu.pipeline_mode<synchronous>, transform_indices = @transform_9, window_bounds = array<i64: 2, 32>}, {pipeline_mode = #tpu.pipeline_mode<synchronous>, transform_indices = @transform_10, window_bounds = array<i64: 2, 32>}]} {
    %c0 = arith.constant 0 : index
    %c0_0 = arith.constant 0 : index
    %0 = memref.load %arg1[%c0, %c0_0] : memref<2x8xi32, #tpu.memory_space<smem>>
    %1 = arith.index_cast %0 : i32 to index
    %c0_1 = arith.constant 0 : index
    %2 = vector.load %arg2[%1, %c0_1] : memref<64x32xf32, #tpu.memory_space<vmem>>, vector<1x32xf32>
    %c0_2 = arith.constant 0 : index
    %c0_3 = arith.constant 0 : index
    %3 = vector.load %arg13[%c0_2, %c0_3] : memref<16x32xf32, #tpu.memory_space<vmem>>, vector<1x32xf32>
    tpu.vector_store %arg13[%c0_2, %c0_3], %2 {strides = array<i32>} : memref<16x32xf32, #tpu.memory_space<vmem>>, vector<1x32xf32>,
    %c1 = arith.constant 1 : index
    %c0_4 = arith.constant 0 : index
    %4 = memref.load %arg1[%c1, %c0_4] : memref<2x8xi32, #tpu.memory_space<smem>>
    %5 = arith.index_cast %4 : i32 to index
    %c0_5 = arith.constant 0 : index
    %6 = vector.load %arg2[%5, %c0_5] : memref<64x32xf32, #tpu.memory_space<vmem>>, vector<1x32xf32>
    %c1_6 = arith.constant 1 : index
    %c0_7 = arith.constant 0 : index
    %7 = vector.load %arg13[%c1_6, %c0_7] : memref<16x32xf32, #tpu.memory_space<vmem>>, vector<1x32xf32>
    tpu.vector_store %arg13[%c1_6, %c0_7], %6 {strides = array<i32>} : memref<16x32xf32, #tpu.memory_space<vmem>>, vector<1x32xf32>,
    %c0_8 = arith.constant 0 : index
    %c1_9 = arith.constant 1 : index
    %8 = memref.load %arg1[%c0_8, %c1_9] : memref<2x8xi32, #tpu.memory_space<smem>>
    %9 = arith.index_cast %8 : i32 to index
    %c0_10 = arith.constant 0 : index
    %10 = vector.load %arg2[%9, %c0_10] : memref<64x32xf32, #tpu.memory_space<vmem>>, vector<1x32xf32>
    %c2 = arith.constant 2 : index
    %c0_11 = arith.constant 0 : index
    %11 = vector.load %arg13[%c2, %c0_11] : memref<16x32xf32, #tpu.memory_space<vmem>>, vector<1x32xf32>
    tpu.vector_store %arg13[%c2, %c0_11], %10 {strides = array<i32>} : memref<16x32xf32, #tpu.memory_space<vmem>>, vector<1x32xf32>,
    %c1_12 = arith.constant 1 : index
    %c1_13 = arith.constant 1 : index
    %12 = memref.load %arg1[%c1_12, %c1_13] : memref<2x8xi32, #tpu.memory_space<smem>>
    %13 = arith.index_cast %12 : i32 to index
    %c0_14 = arith.constant 0 : index
    %14 = vector.load %arg2[%13, %c0_14] : memref<64x32xf32, #tpu.memory_space<vmem>>, vector<1x32xf32>
    %c3 = arith.constant 3 : index
    %c0_15 = arith.constant 0 : index
    %15 = vector.load %arg13[%c3, %c0_15] : memref<16x32xf32, #tpu.memory_space<vmem>>, vector<1x32xf32>
    tpu.vector_store %arg13[%c3, %c0_15], %14 {strides = array<i32>} : memref<16x32xf32, #tpu.memory_space<vmem>>, vector<1x32xf32>,
    %c0_16 = arith.constant 0 : index
    %c2_17 = arith.constant 2 : index
    %16 = memref.load %arg1[%c0_16, %c2_17] : memref<2x8xi32, #tpu.memory_space<smem>>
    %17 = arith.index_cast %16 : i32 to index
    %c0_18 = arith.constant 0 : index
    %18 = vector.load %arg2[%17, %c0_18] : memref<64x32xf32, #tpu.memory_space<vmem>>, vector<1x32xf32>
    %c4 = arith.constant 4 : index
    %c0_19 = arith.constant 0 : index
    %19 = vector.load %arg13[%c4, %c0_19] : memref<16x32xf32, #tpu.memory_space<vmem>>, vector<1x32xf32>
    tpu.vector_store %arg13[%c4, %c0_19], %18 {strides = array<i32>} : memref<16x32xf32, #tpu.memory_space<vmem>>, vector<1x32xf32>,
    %c1_20 = arith.constant 1 : index
    %c2_21 = arith.constant 2 : index
    %20 = memref.load %arg1[%c1_20, %c2_21] : memref<2x8xi32, #tpu.memory_space<smem>>
    %21 = arith.index_cast %20 : i32 to index
    %c0_22 = arith.constant 0 : index
    %22 = vector.load %arg2[%21, %c0_22] : memref<64x32xf32, #tpu.memory_space<vmem>>, vector<1x32xf32>
    %c5 = arith.constant 5 : index
    %c0_23 = arith.constant 0 : index
    %23 = vector.load %arg13[%c5, %c0_23] : memref<16x32xf32, #tpu.memory_space<vmem>>, vector<1x32xf32>
    tpu.vector_store %arg13[%c5, %c0_23], %22 {strides = array<i32>} : memref<16x32xf32, #tpu.memory_space<vmem>>, vector<1x32xf32>,
    %c0_24 = arith.constant 0 : index
    %c3_25 = arith.constant 3 : index
    %24 = memref.load %arg1[%c0_24, %c3_25] : memref<2x8xi32, #tpu.memory_space<smem>>
    %25 = arith.index_cast %24 : i32 to index
    %c0_26 = arith.constant 0 : index
    %26 = vector.load %arg2[%25, %c0_26] : memref<64x32xf32, #tpu.memory_space<vmem>>, vector<1x32xf32>
    %c6 = arith.constant 6 : index
    %c0_27 = arith.constant 0 : index
    %27 = vector.load %arg13[%c6, %c0_27] : memref<16x32xf32, #tpu.memory_space<vmem>>, vector<1x32xf32>
    tpu.vector_store %arg13[%c6, %c0_27], %26 {strides = array<i32>} : memref<16x32xf32, #tpu.memory_space<vmem>>, vector<1x32xf32>,
    %c1_28 = arith.constant 1 : index
    %c3_29 = arith.constant 3 : index
    %28 = memref.load %arg1[%c1_28, %c3_29] : memref<2x8xi32, #tpu.memory_space<smem>>
    %29 = arith.index_cast %28 : i32 to index
    %c0_30 = arith.constant 0 : index
    %30 = vector.load %arg2[%29, %c0_30] : memref<64x32xf32, #tpu.memory_space<vmem>>, vector<1x32xf32>
    %c7 = arith.constant 7 : index
    %c0_31 = arith.constant 0 : index
    %31 = vector.load %arg13[%c7, %c0_31] : memref<16x32xf32, #tpu.memory_space<vmem>>, vector<1x32xf32>
    tpu.vector_store %arg13[%c7, %c0_31], %30 {strides = array<i32>} : memref<16x32xf32, #tpu.memory_space<vmem>>, vector<1x32xf32>,
    %c0_32 = arith.constant 0 : index
    %c4_33 = arith.constant 4 : index
    %32 = memref.load %arg1[%c0_32, %c4_33] : memref<2x8xi32, #tpu.memory_space<smem>>
    %33 = arith.index_cast %32 : i32 to index
    %c0_34 = arith.constant 0 : index
    %34 = vector.load %arg2[%33, %c0_34] : memref<64x32xf32, #tpu.memory_space<vmem>>, vector<1x32xf32>
    %c8 = arith.constant 8 : index
    %c0_35 = arith.constant 0 : index
    %35 = vector.load %arg13[%c8, %c0_35] : memref<16x32xf32, #tpu.memory_space<vmem>>, vector<1x32xf32>
    tpu.vector_store %arg13[%c8, %c0_35], %34 {strides = array<i32>} : memref<16x32xf32, #tpu.memory_space<vmem>>, vector<1x32xf32>,
    %c1_36 = arith.constant 1 : index
    %c4_37 = arith.constant 4 : index
    %36 = memref.load %arg1[%c1_36, %c4_37] : memref<2x8xi32, #tpu.memory_space<smem>>
    %37 = arith.index_cast %36 : i32 to index
    %c0_38 = arith.constant 0 : index
    %38 = vector.load %arg2[%37, %c0_38] : memref<64x32xf32, #tpu.memory_space<vmem>>, vector<1x32xf32>
    %c9 = arith.constant 9 : index
    %c0_39 = arith.constant 0 : index
    %39 = vector.load %arg13[%c9, %c0_39] : memref<16x32xf32, #tpu.memory_space<vmem>>, vector<1x32xf32>
    tpu.vector_store %arg13[%c9, %c0_39], %38 {strides = array<i32>} : memref<16x32xf32, #tpu.memory_space<vmem>>, vector<1x32xf32>,
    %c0_40 = arith.constant 0 : index
    %c5_41 = arith.constant 5 : index
    %40 = memref.load %arg1[%c0_40, %c5_41] : memref<2x8xi32, #tpu.memory_space<smem>>
    %41 = arith.index_cast %40 : i32 to index
    %c0_42 = arith.constant 0 : index
    %42 = vector.load %arg2[%41, %c0_42] : memref<64x32xf32, #tpu.memory_space<vmem>>, vector<1x32xf32>
    %c10 = arith.constant 10 : index
    %c0_43 = arith.constant 0 : index
    %43 = vector.load %arg13[%c10, %c0_43] : memref<16x32xf32, #tpu.memory_space<vmem>>, vector<1x32xf32>
    tpu.vector_store %arg13[%c10, %c0_43], %42 {strides = array<i32>} : memref<16x32xf32, #tpu.memory_space<vmem>>, vector<1x32xf32>,
    %c1_44 = arith.constant 1 : index
    %c5_45 = arith.constant 5 : index
    %44 = memref.load %arg1[%c1_44, %c5_45] : memref<2x8xi32, #tpu.memory_space<smem>>
    %45 = arith.index_cast %44 : i32 to index
    %c0_46 = arith.constant 0 : index
    %46 = vector.load %arg2[%45, %c0_46] : memref<64x32xf32, #tpu.memory_space<vmem>>, vector<1x32xf32>
    %c11 = arith.constant 11 : index
    %c0_47 = arith.constant 0 : index
    %47 = vector.load %arg13[%c11, %c0_47] : memref<16x32xf32, #tpu.memory_space<vmem>>, vector<1x32xf32>
    tpu.vector_store %arg13[%c11, %c0_47], %46 {strides = array<i32>} : memref<16x32xf32, #tpu.memory_space<vmem>>, vector<1x32xf32>,
    %c0_48 = arith.constant 0 : index
    %c6_49 = arith.constant 6 : index
    %48 = memref.load %arg1[%c0_48, %c6_49] : memref<2x8xi32, #tpu.memory_space<smem>>
    %49 = arith.index_cast %48 : i32 to index
    %c0_50 = arith.constant 0 : index
    %50 = vector.load %arg2[%49, %c0_50] : memref<64x32xf32, #tpu.memory_space<vmem>>, vector<1x32xf32>
    %c12 = arith.constant 12 : index
    %c0_51 = arith.constant 0 : index
    %51 = vector.load %arg13[%c12, %c0_51] : memref<16x32xf32, #tpu.memory_space<vmem>>, vector<1x32xf32>
    tpu.vector_store %arg13[%c12, %c0_51], %50 {strides = array<i32>} : memref<16x32xf32, #tpu.memory_space<vmem>>, vector<1x32xf32>,
    %c1_52 = arith.constant 1 : index
    %c6_53 = arith.constant 6 : index
    %52 = memref.load %arg1[%c1_52, %c6_53] : memref<2x8xi32, #tpu.memory_space<smem>>
    %53 = arith.index_cast %52 : i32 to index
    %c0_54 = arith.constant 0 : index
    %54 = vector.load %arg2[%53, %c0_54] : memref<64x32xf32, #tpu.memory_space<vmem>>, vector<1x32xf32>
    %c13 = arith.constant 13 : index
    %c0_55 = arith.constant 0 : index
    %55 = vector.load %arg13[%c13, %c0_55] : memref<16x32xf32, #tpu.memory_space<vmem>>, vector<1x32xf32>
    tpu.vector_store %arg13[%c13, %c0_55], %54 {strides = array<i32>} : memref<16x32xf32, #tpu.memory_space<vmem>>, vector<1x32xf32>,
    %c0_56 = arith.constant 0 : index
    %c7_57 = arith.constant 7 : index
    %56 = memref.load %arg1[%c0_56, %c7_57] : memref<2x8xi32, #tpu.memory_space<smem>>
    %57 = arith.index_cast %56 : i32 to index
    %c0_58 = arith.constant 0 : index
    %58 = vector.load %arg2[%57, %c0_58] : memref<64x32xf32, #tpu.memory_space<vmem>>, vector<1x32xf32>
    %c14 = arith.constant 14 : index
    %c0_59 = arith.constant 0 : index
    %59 = vector.load %arg13[%c14, %c0_59] : memref<16x32xf32, #tpu.memory_space<vmem>>, vector<1x32xf32>
    tpu.vector_store %arg13[%c14, %c0_59], %58 {strides = array<i32>} : memref<16x32xf32, #tpu.memory_space<vmem>>, vector<1x32xf32>,
    %c1_60 = arith.constant 1 : index
    %c7_61 = arith.constant 7 : index
    %60 = memref.load %arg1[%c1_60, %c7_61] : memref<2x8xi32, #tpu.memory_space<smem>>
    %61 = arith.index_cast %60 : i32 to index
    %c0_62 = arith.constant 0 : index
    %62 = vector.load %arg2[%61, %c0_62] : memref<64x32xf32, #tpu.memory_space<vmem>>, vector<1x32xf32>
    %c15 = arith.constant 15 : index
    %c0_63 = arith.constant 0 : index
    %63 = vector.load %arg13[%c15, %c0_63] : memref<16x32xf32, #tpu.memory_space<vmem>>, vector<1x32xf32>
    tpu.vector_store %arg13[%c15, %c0_63], %62 {strides = array<i32>} : memref<16x32xf32, #tpu.memory_space<vmem>>, vector<1x32xf32>,
    %c0_64 = arith.constant 0 : index
    %c0_65 = arith.constant 0 : index
    %64 = vector.load %arg13[%c0_64, %c0_65] : memref<16x32xf32, #tpu.memory_space<vmem>>, vector<16x32xf32>
    %c0_66 = arith.constant 0 : index
    %c0_67 = arith.constant 0 : index
    %65 = vector.load %arg3[%c0_66, %c0_67] : memref<32x128xf32, #tpu.memory_space<vmem>>, vector<32x128xf32>
    %cst = arith.constant dense<0.000000e+00> : vector<16x128xf32>
    %66 = tpu.matmul %64, %65, %cst {dimension_numbers = #tpu.dot_dimension_numbers<[1], [0], [0], [1], [0, 0, 1, 1], [], []>} : vector<16x32xf32>, vector<32x128xf32>, vector<16x128xf32> -> vector<16x128xf32>
    %c0_68 = arith.constant 0 : index
    %c0_69 = arith.constant 0 : index
    %67 = vector.load %arg5[%c0_68, %c0_69] : memref<1x128xf32, #tpu.memory_space<vmem>>, vector<1x128xf32>
    %68 = vector.broadcast %67 : vector<1x128xf32> to vector<16x128xf32>
    %69 = arith.addf %66, %68 : vector<16x128xf32>
    %c0_70 = arith.constant 0 : index
    %c0_71 = arith.constant 0 : index
    %70 = vector.load %arg8[%c0_70, %c0_71] : memref<2x32xf32, #tpu.memory_space<vmem>>, vector<2x32xf32>
    %c0_72 = arith.constant 0 : index
    %c0_73 = arith.constant 0 : index
    %71 = vector.load %arg9[%c0_72, %c0_73] : memref<2x32xf32, #tpu.memory_space<vmem>>, vector<2x32xf32>
    %72 = vector.extract_strided_slice %69 {offsets = [0, 0], sizes = [2, 128], strides = [1, 1]} : vector<16x128xf32> to vector<2x128xf32>
    %c0_74 = arith.constant 0 : index
    %c0_75 = arith.constant 0 : index
    %73 = vector.load %arg4[%c0_74, %c0_75] : memref<32x128xf32, #tpu.memory_space<vmem>>, vector<32x128xf32>
    %cst_76 = arith.constant dense<0.000000e+00> : vector<2x128xf32>
    %74 = tpu.matmul %70, %73, %cst_76 {dimension_numbers = #tpu.dot_dimension_numbers<[1], [0], [0], [1], [0, 0, 1, 1], [], []>} : vector<2x32xf32>, vector<32x128xf32>, vector<2x128xf32> -> vector<2x128xf32>
    %75 = arith.addf %72, %74 : vector<2x128xf32>
    %76 = arith.negf %75 : vector<2x128xf32>
    %77 = math.exp %76 : vector<2x128xf32>
    %cst_77 = arith.constant 1.000000e+00 : f32
    %78 = vector.broadcast %cst_77 : f32 to vector<2x128xf32>
    %79 = arith.addf %78, %77 : vector<2x128xf32>
    %80 = arith.divf %78, %79 : vector<2x128xf32>
    %81 = math.tanh %75 : vector<2x128xf32>
    %82 = vector.extract_strided_slice %80 {offsets = [0, 0], sizes = [2, 32], strides = [1, 1]} : vector<2x128xf32> to vector<2x32xf32>
    %83 = vector.extract_strided_slice %80 {offsets = [0, 32], sizes = [2, 32], strides = [1, 1]} : vector<2x128xf32> to vector<2x32xf32>
    %84 = vector.extract_strided_slice %81 {offsets = [0, 64], sizes = [2, 32], strides = [1, 1]} : vector<2x128xf32> to vector<2x32xf32>
    %85 = vector.extract_strided_slice %80 {offsets = [0, 96], sizes = [2, 32], strides = [1, 1]} : vector<2x128xf32> to vector<2x32xf32>
    %86 = arith.mulf %83, %71 : vector<2x32xf32>
    %87 = arith.mulf %82, %84 : vector<2x32xf32>
    %88 = arith.addf %86, %87 : vector<2x32xf32>
    %89 = math.tanh %88 : vector<2x32xf32>
    %90 = arith.mulf %85, %89 : vector<2x32xf32>
    %91 = vector.extract_strided_slice %90 {offsets = [0, 0], sizes = [1, 32], strides = [1, 1]} : vector<2x32xf32> to vector<1x32xf32>
    %c0_78 = arith.constant 0 : index
    %c0_79 = arith.constant 0 : index
    %92 = vector.load %arg14[%c0_78, %c0_79] : memref<16x32xf32, #tpu.memory_space<vmem>>, vector<1x32xf32>
    tpu.vector_store %arg14[%c0_78, %c0_79], %91 {strides = array<i32>} : memref<16x32xf32, #tpu.memory_space<vmem>>, vector<1x32xf32>,
    %93 = vector.extract_strided_slice %90 {offsets = [1, 0], sizes = [1, 32], strides = [1, 1]} : vector<2x32xf32> to vector<1x32xf32>
    %c8_80 = arith.constant 8 : index
    %c0_81 = arith.constant 0 : index
    %94 = vector.load %arg14[%c8_80, %c0_81] : memref<16x32xf32, #tpu.memory_space<vmem>>, vector<1x32xf32>
    tpu.vector_store %arg14[%c8_80, %c0_81], %93 {strides = array<i32>} : memref<16x32xf32, #tpu.memory_space<vmem>>, vector<1x32xf32>,
    %95 = vector.extract_strided_slice %69 {offsets = [2, 0], sizes = [2, 128], strides = [1, 1]} : vector<16x128xf32> to vector<2x128xf32>
    %c0_82 = arith.constant 0 : index
    %c0_83 = arith.constant 0 : index
    %96 = vector.load %arg4[%c0_82, %c0_83] : memref<32x128xf32, #tpu.memory_space<vmem>>, vector<32x128xf32>
    %cst_84 = arith.constant dense<0.000000e+00> : vector<2x128xf32>
    %97 = tpu.matmul %90, %96, %cst_84 {dimension_numbers = #tpu.dot_dimension_numbers<[1], [0], [0], [1], [0, 0, 1, 1], [], []>} : vector<2x32xf32>, vector<32x128xf32>, vector<2x128xf32> -> vector<2x128xf32>
    %98 = arith.addf %95, %97 : vector<2x128xf32>
    %99 = arith.negf %98 : vector<2x128xf32>
    %100 = math.exp %99 : vector<2x128xf32>
    %cst_85 = arith.constant 1.000000e+00 : f32
    %101 = vector.broadcast %cst_85 : f32 to vector<2x128xf32>
    %102 = arith.addf %101, %100 : vector<2x128xf32>
    %103 = arith.divf %101, %102 : vector<2x128xf32>
    %104 = math.tanh %98 : vector<2x128xf32>
    %105 = vector.extract_strided_slice %103 {offsets = [0, 0], sizes = [2, 32], strides = [1, 1]} : vector<2x128xf32> to vector<2x32xf32>
    %106 = vector.extract_strided_slice %103 {offsets = [0, 32], sizes = [2, 32], strides = [1, 1]} : vector<2x128xf32> to vector<2x32xf32>
    %107 = vector.extract_strided_slice %104 {offsets = [0, 64], sizes = [2, 32], strides = [1, 1]} : vector<2x128xf32> to vector<2x32xf32>
    %108 = vector.extract_strided_slice %103 {offsets = [0, 96], sizes = [2, 32], strides = [1, 1]} : vector<2x128xf32> to vector<2x32xf32>
    %109 = arith.mulf %106, %88 : vector<2x32xf32>
    %110 = arith.mulf %105, %107 : vector<2x32xf32>
    %111 = arith.addf %109, %110 : vector<2x32xf32>
    %112 = math.tanh %111 : vector<2x32xf32>
    %113 = arith.mulf %108, %112 : vector<2x32xf32>
    %114 = vector.extract_strided_slice %113 {offsets = [0, 0], sizes = [1, 32], strides = [1, 1]} : vector<2x32xf32> to vector<1x32xf32>
    %c1_86 = arith.constant 1 : index
    %c0_87 = arith.constant 0 : index
    %115 = vector.load %arg14[%c1_86, %c0_87] : memref<16x32xf32, #tpu.memory_space<vmem>>, vector<1x32xf32>
    tpu.vector_store %arg14[%c1_86, %c0_87], %114 {strides = array<i32>} : memref<16x32xf32, #tpu.memory_space<vmem>>, vector<1x32xf32>,
    %116 = vector.extract_strided_slice %113 {offsets = [1, 0], sizes = [1, 32], strides = [1, 1]} : vector<2x32xf32> to vector<1x32xf32>
    %c9_88 = arith.constant 9 : index
    %c0_89 = arith.constant 0 : index
    %117 = vector.load %arg14[%c9_88, %c0_89] : memref<16x32xf32, #tpu.memory_space<vmem>>, vector<1x32xf32>
    tpu.vector_store %arg14[%c9_88, %c0_89], %116 {strides = array<i32>} : memref<16x32xf32, #tpu.memory_space<vmem>>, vector<1x32xf32>,
    %118 = vector.extract_strided_slice %69 {offsets = [4, 0], sizes = [2, 128], strides = [1, 1]} : vector<16x128xf32> to vector<2x128xf32>
    %c0_90 = arith.constant 0 : index
    %c0_91 = arith.constant 0 : index
    %119 = vector.load %arg4[%c0_90, %c0_91] : memref<32x128xf32, #tpu.memory_space<vmem>>, vector<32x128xf32>
    %cst_92 = arith.constant dense<0.000000e+00> : vector<2x128xf32>
    %120 = tpu.matmul %113, %119, %cst_92 {dimension_numbers = #tpu.dot_dimension_numbers<[1], [0], [0], [1], [0, 0, 1, 1], [], []>} : vector<2x32xf32>, vector<32x128xf32>, vector<2x128xf32> -> vector<2x128xf32>
    %121 = arith.addf %118, %120 : vector<2x128xf32>
    %122 = arith.negf %121 : vector<2x128xf32>
    %123 = math.exp %122 : vector<2x128xf32>
    %cst_93 = arith.constant 1.000000e+00 : f32
    %124 = vector.broadcast %cst_93 : f32 to vector<2x128xf32>
    %125 = arith.addf %124, %123 : vector<2x128xf32>
    %126 = arith.divf %124, %125 : vector<2x128xf32>
    %127 = math.tanh %121 : vector<2x128xf32>
    %128 = vector.extract_strided_slice %126 {offsets = [0, 0], sizes = [2, 32], strides = [1, 1]} : vector<2x128xf32> to vector<2x32xf32>
    %129 = vector.extract_strided_slice %126 {offsets = [0, 32], sizes = [2, 32], strides = [1, 1]} : vector<2x128xf32> to vector<2x32xf32>
    %130 = vector.extract_strided_slice %127 {offsets = [0, 64], sizes = [2, 32], strides = [1, 1]} : vector<2x128xf32> to vector<2x32xf32>
    %131 = vector.extract_strided_slice %126 {offsets = [0, 96], sizes = [2, 32], strides = [1, 1]} : vector<2x128xf32> to vector<2x32xf32>
    %132 = arith.mulf %129, %111 : vector<2x32xf32>
    %133 = arith.mulf %128, %130 : vector<2x32xf32>
    %134 = arith.addf %132, %133 : vector<2x32xf32>
    %135 = math.tanh %134 : vector<2x32xf32>
    %136 = arith.mulf %131, %135 : vector<2x32xf32>
    %137 = vector.extract_strided_slice %136 {offsets = [0, 0], sizes = [1, 32], strides = [1, 1]} : vector<2x32xf32> to vector<1x32xf32>
    %c2_94 = arith.constant 2 : index
    %c0_95 = arith.constant 0 : index
    %138 = vector.load %arg14[%c2_94, %c0_95] : memref<16x32xf32, #tpu.memory_space<vmem>>, vector<1x32xf32>
    tpu.vector_store %arg14[%c2_94, %c0_95], %137 {strides = array<i32>} : memref<16x32xf32, #tpu.memory_space<vmem>>, vector<1x32xf32>,
    %139 = vector.extract_strided_slice %136 {offsets = [1, 0], sizes = [1, 32], strides = [1, 1]} : vector<2x32xf32> to vector<1x32xf32>
    %c10_96 = arith.constant 10 : index
    %c0_97 = arith.constant 0 : index
    %140 = vector.load %arg14[%c10_96, %c0_97] : memref<16x32xf32, #tpu.memory_space<vmem>>, vector<1x32xf32>
    tpu.vector_store %arg14[%c10_96, %c0_97], %139 {strides = array<i32>} : memref<16x32xf32, #tpu.memory_space<vmem>>, vector<1x32xf32>,
    %141 = vector.extract_strided_slice %69 {offsets = [6, 0], sizes = [2, 128], strides = [1, 1]} : vector<16x128xf32> to vector<2x128xf32>
    %c0_98 = arith.constant 0 : index
    %c0_99 = arith.constant 0 : index
    %142 = vector.load %arg4[%c0_98, %c0_99] : memref<32x128xf32, #tpu.memory_space<vmem>>, vector<32x128xf32>
    %cst_100 = arith.constant dense<0.000000e+00> : vector<2x128xf32>
    %143 = tpu.matmul %136, %142, %cst_100 {dimension_numbers = #tpu.dot_dimension_numbers<[1], [0], [0], [1], [0, 0, 1, 1], [], []>} : vector<2x32xf32>, vector<32x128xf32>, vector<2x128xf32> -> vector<2x128xf32>
    %144 = arith.addf %141, %143 : vector<2x128xf32>
    %145 = arith.negf %144 : vector<2x128xf32>
    %146 = math.exp %145 : vector<2x128xf32>
    %cst_101 = arith.constant 1.000000e+00 : f32
    %147 = vector.broadcast %cst_101 : f32 to vector<2x128xf32>
    %148 = arith.addf %147, %146 : vector<2x128xf32>
    %149 = arith.divf %147, %148 : vector<2x128xf32>
    %150 = math.tanh %144 : vector<2x128xf32>
    %151 = vector.extract_strided_slice %149 {offsets = [0, 0], sizes = [2, 32], strides = [1, 1]} : vector<2x128xf32> to vector<2x32xf32>
    %152 = vector.extract_strided_slice %149 {offsets = [0, 32], sizes = [2, 32], strides = [1, 1]} : vector<2x128xf32> to vector<2x32xf32>
    %153 = vector.extract_strided_slice %150 {offsets = [0, 64], sizes = [2, 32], strides = [1, 1]} : vector<2x128xf32> to vector<2x32xf32>
    %154 = vector.extract_strided_slice %149 {offsets = [0, 96], sizes = [2, 32], strides = [1, 1]} : vector<2x128xf32> to vector<2x32xf32>
    %155 = arith.mulf %152, %134 : vector<2x32xf32>
    %156 = arith.mulf %151, %153 : vector<2x32xf32>
    %157 = arith.addf %155, %156 : vector<2x32xf32>
    %158 = math.tanh %157 : vector<2x32xf32>
    %159 = arith.mulf %154, %158 : vector<2x32xf32>
    %160 = vector.extract_strided_slice %159 {offsets = [0, 0], sizes = [1, 32], strides = [1, 1]} : vector<2x32xf32> to vector<1x32xf32>
    %c3_102 = arith.constant 3 : index
    %c0_103 = arith.constant 0 : index
    %161 = vector.load %arg14[%c3_102, %c0_103] : memref<16x32xf32, #tpu.memory_space<vmem>>, vector<1x32xf32>
    tpu.vector_store %arg14[%c3_102, %c0_103], %160 {strides = array<i32>} : memref<16x32xf32, #tpu.memory_space<vmem>>, vector<1x32xf32>,
    %162 = vector.extract_strided_slice %159 {offsets = [1, 0], sizes = [1, 32], strides = [1, 1]} : vector<2x32xf32> to vector<1x32xf32>
    %c11_104 = arith.constant 11 : index
    %c0_105 = arith.constant 0 : index
    %163 = vector.load %arg14[%c11_104, %c0_105] : memref<16x32xf32, #tpu.memory_space<vmem>>, vector<1x32xf32>
    tpu.vector_store %arg14[%c11_104, %c0_105], %162 {strides = array<i32>} : memref<16x32xf32, #tpu.memory_space<vmem>>, vector<1x32xf32>,
    %164 = vector.extract_strided_slice %69 {offsets = [8, 0], sizes = [2, 128], strides = [1, 1]} : vector<16x128xf32> to vector<2x128xf32>
    %c0_106 = arith.constant 0 : index
    %c0_107 = arith.constant 0 : index
    %165 = vector.load %arg4[%c0_106, %c0_107] : memref<32x128xf32, #tpu.memory_space<vmem>>, vector<32x128xf32>
    %cst_108 = arith.constant dense<0.000000e+00> : vector<2x128xf32>
    %166 = tpu.matmul %159, %165, %cst_108 {dimension_numbers = #tpu.dot_dimension_numbers<[1], [0], [0], [1], [0, 0, 1, 1], [], []>} : vector<2x32xf32>, vector<32x128xf32>, vector<2x128xf32> -> vector<2x128xf32>
    %167 = arith.addf %164, %166 : vector<2x128xf32>
    %168 = arith.negf %167 : vector<2x128xf32>
    %169 = math.exp %168 : vector<2x128xf32>
    %cst_109 = arith.constant 1.000000e+00 : f32
    %170 = vector.broadcast %cst_109 : f32 to vector<2x128xf32>
    %171 = arith.addf %170, %169 : vector<2x128xf32>
    %172 = arith.divf %170, %171 : vector<2x128xf32>
    %173 = math.tanh %167 : vector<2x128xf32>
    %174 = vector.extract_strided_slice %172 {offsets = [0, 0], sizes = [2, 32], strides = [1, 1]} : vector<2x128xf32> to vector<2x32xf32>
    %175 = vector.extract_strided_slice %172 {offsets = [0, 32], sizes = [2, 32], strides = [1, 1]} : vector<2x128xf32> to vector<2x32xf32>
    %176 = vector.extract_strided_slice %173 {offsets = [0, 64], sizes = [2, 32], strides = [1, 1]} : vector<2x128xf32> to vector<2x32xf32>
    %177 = vector.extract_strided_slice %172 {offsets = [0, 96], sizes = [2, 32], strides = [1, 1]} : vector<2x128xf32> to vector<2x32xf32>
    %178 = arith.mulf %175, %157 : vector<2x32xf32>
    %179 = arith.mulf %174, %176 : vector<2x32xf32>
    %180 = arith.addf %178, %179 : vector<2x32xf32>
    %181 = math.tanh %180 : vector<2x32xf32>
    %182 = arith.mulf %177, %181 : vector<2x32xf32>
    %183 = vector.extract_strided_slice %182 {offsets = [0, 0], sizes = [1, 32], strides = [1, 1]} : vector<2x32xf32> to vector<1x32xf32>
    %c4_110 = arith.constant 4 : index
    %c0_111 = arith.constant 0 : index
    %184 = vector.load %arg14[%c4_110, %c0_111] : memref<16x32xf32, #tpu.memory_space<vmem>>, vector<1x32xf32>
    tpu.vector_store %arg14[%c4_110, %c0_111], %183 {strides = array<i32>} : memref<16x32xf32, #tpu.memory_space<vmem>>, vector<1x32xf32>,
    %185 = vector.extract_strided_slice %182 {offsets = [1, 0], sizes = [1, 32], strides = [1, 1]} : vector<2x32xf32> to vector<1x32xf32>
    %c12_112 = arith.constant 12 : index
    %c0_113 = arith.constant 0 : index
    %186 = vector.load %arg14[%c12_112, %c0_113] : memref<16x32xf32, #tpu.memory_space<vmem>>, vector<1x32xf32>
    tpu.vector_store %arg14[%c12_112, %c0_113], %185 {strides = array<i32>} : memref<16x32xf32, #tpu.memory_space<vmem>>, vector<1x32xf32>,
    %187 = vector.extract_strided_slice %69 {offsets = [10, 0], sizes = [2, 128], strides = [1, 1]} : vector<16x128xf32> to vector<2x128xf32>
    %c0_114 = arith.constant 0 : index
    %c0_115 = arith.constant 0 : index
    %188 = vector.load %arg4[%c0_114, %c0_115] : memref<32x128xf32, #tpu.memory_space<vmem>>, vector<32x128xf32>
    %cst_116 = arith.constant dense<0.000000e+00> : vector<2x128xf32>
    %189 = tpu.matmul %182, %188, %cst_116 {dimension_numbers = #tpu.dot_dimension_numbers<[1], [0], [0], [1], [0, 0, 1, 1], [], []>} : vector<2x32xf32>, vector<32x128xf32>, vector<2x128xf32> -> vector<2x128xf32>
    %190 = arith.addf %187, %189 : vector<2x128xf32>
    %191 = arith.negf %190 : vector<2x128xf32>
    %192 = math.exp %191 : vector<2x128xf32>
    %cst_117 = arith.constant 1.000000e+00 : f32
    %193 = vector.broadcast %cst_117 : f32 to vector<2x128xf32>
    %194 = arith.addf %193, %192 : vector<2x128xf32>
    %195 = arith.divf %193, %194 : vector<2x128xf32>
    %196 = math.tanh %190 : vector<2x128xf32>
    %197 = vector.extract_strided_slice %195 {offsets = [0, 0], sizes = [2, 32], strides = [1, 1]} : vector<2x128xf32> to vector<2x32xf32>
    %198 = vector.extract_strided_slice %195 {offsets = [0, 32], sizes = [2, 32], strides = [1, 1]} : vector<2x128xf32> to vector<2x32xf32>
    %199 = vector.extract_strided_slice %196 {offsets = [0, 64], sizes = [2, 32], strides = [1, 1]} : vector<2x128xf32> to vector<2x32xf32>
    %200 = vector.extract_strided_slice %195 {offsets = [0, 96], sizes = [2, 32], strides = [1, 1]} : vector<2x128xf32> to vector<2x32xf32>
    %201 = arith.mulf %198, %180 : vector<2x32xf32>
    %202 = arith.mulf %197, %199 : vector<2x32xf32>
    %203 = arith.addf %201, %202 : vector<2x32xf32>
    %204 = math.tanh %203 : vector<2x32xf32>
    %205 = arith.mulf %200, %204 : vector<2x32xf32>
    %206 = vector.extract_strided_slice %205 {offsets = [0, 0], sizes = [1, 32], strides = [1, 1]} : vector<2x32xf32> to vector<1x32xf32>
    %c5_118 = arith.constant 5 : index
    %c0_119 = arith.constant 0 : index
    %207 = vector.load %arg14[%c5_118, %c0_119] : memref<16x32xf32, #tpu.memory_space<vmem>>, vector<1x32xf32>
    tpu.vector_store %arg14[%c5_118, %c0_119], %206 {strides = array<i32>} : memref<16x32xf32, #tpu.memory_space<vmem>>, vector<1x32xf32>,
    %208 = vector.extract_strided_slice %205 {offsets = [1, 0], sizes = [1, 32], strides = [1, 1]} : vector<2x32xf32> to vector<1x32xf32>
    %c13_120 = arith.constant 13 : index
    %c0_121 = arith.constant 0 : index
    %209 = vector.load %arg14[%c13_120, %c0_121] : memref<16x32xf32, #tpu.memory_space<vmem>>, vector<1x32xf32>
    tpu.vector_store %arg14[%c13_120, %c0_121], %208 {strides = array<i32>} : memref<16x32xf32, #tpu.memory_space<vmem>>, vector<1x32xf32>,
    %210 = vector.extract_strided_slice %69 {offsets = [12, 0], sizes = [2, 128], strides = [1, 1]} : vector<16x128xf32> to vector<2x128xf32>
    %c0_122 = arith.constant 0 : index
    %c0_123 = arith.constant 0 : index
    %211 = vector.load %arg4[%c0_122, %c0_123] : memref<32x128xf32, #tpu.memory_space<vmem>>, vector<32x128xf32>
    %cst_124 = arith.constant dense<0.000000e+00> : vector<2x128xf32>
    %212 = tpu.matmul %205, %211, %cst_124 {dimension_numbers = #tpu.dot_dimension_numbers<[1], [0], [0], [1], [0, 0, 1, 1], [], []>} : vector<2x32xf32>, vector<32x128xf32>, vector<2x128xf32> -> vector<2x128xf32>
    %213 = arith.addf %210, %212 : vector<2x128xf32>
    %214 = arith.negf %213 : vector<2x128xf32>
    %215 = math.exp %214 : vector<2x128xf32>
    %cst_125 = arith.constant 1.000000e+00 : f32
    %216 = vector.broadcast %cst_125 : f32 to vector<2x128xf32>
    %217 = arith.addf %216, %215 : vector<2x128xf32>
    %218 = arith.divf %216, %217 : vector<2x128xf32>
    %219 = math.tanh %213 : vector<2x128xf32>
    %220 = vector.extract_strided_slice %218 {offsets = [0, 0], sizes = [2, 32], strides = [1, 1]} : vector<2x128xf32> to vector<2x32xf32>
    %221 = vector.extract_strided_slice %218 {offsets = [0, 32], sizes = [2, 32], strides = [1, 1]} : vector<2x128xf32> to vector<2x32xf32>
    %222 = vector.extract_strided_slice %219 {offsets = [0, 64], sizes = [2, 32], strides = [1, 1]} : vector<2x128xf32> to vector<2x32xf32>
    %223 = vector.extract_strided_slice %218 {offsets = [0, 96], sizes = [2, 32], strides = [1, 1]} : vector<2x128xf32> to vector<2x32xf32>
    %224 = arith.mulf %221, %203 : vector<2x32xf32>
    %225 = arith.mulf %220, %222 : vector<2x32xf32>
    %226 = arith.addf %224, %225 : vector<2x32xf32>
    %227 = math.tanh %226 : vector<2x32xf32>
    %228 = arith.mulf %223, %227 : vector<2x32xf32>
    %229 = vector.extract_strided_slice %228 {offsets = [0, 0], sizes = [1, 32], strides = [1, 1]} : vector<2x32xf32> to vector<1x32xf32>
    %c6_126 = arith.constant 6 : index
    %c0_127 = arith.constant 0 : index
    %230 = vector.load %arg14[%c6_126, %c0_127] : memref<16x32xf32, #tpu.memory_space<vmem>>, vector<1x32xf32>
    tpu.vector_store %arg14[%c6_126, %c0_127], %229 {strides = array<i32>} : memref<16x32xf32, #tpu.memory_space<vmem>>, vector<1x32xf32>,
    %231 = vector.extract_strided_slice %228 {offsets = [1, 0], sizes = [1, 32], strides = [1, 1]} : vector<2x32xf32> to vector<1x32xf32>
    %c14_128 = arith.constant 14 : index
    %c0_129 = arith.constant 0 : index
    %232 = vector.load %arg14[%c14_128, %c0_129] : memref<16x32xf32, #tpu.memory_space<vmem>>, vector<1x32xf32>
    tpu.vector_store %arg14[%c14_128, %c0_129], %231 {strides = array<i32>} : memref<16x32xf32, #tpu.memory_space<vmem>>, vector<1x32xf32>,
    %233 = vector.extract_strided_slice %69 {offsets = [14, 0], sizes = [2, 128], strides = [1, 1]} : vector<16x128xf32> to vector<2x128xf32>
    %c0_130 = arith.constant 0 : index
    %c0_131 = arith.constant 0 : index
    %234 = vector.load %arg4[%c0_130, %c0_131] : memref<32x128xf32, #tpu.memory_space<vmem>>, vector<32x128xf32>
    %cst_132 = arith.constant dense<0.000000e+00> : vector<2x128xf32>
    %235 = tpu.matmul %228, %234, %cst_132 {dimension_numbers = #tpu.dot_dimension_numbers<[1], [0], [0], [1], [0, 0, 1, 1], [], []>} : vector<2x32xf32>, vector<32x128xf32>, vector<2x128xf32> -> vector<2x128xf32>
    %236 = arith.addf %233, %235 : vector<2x128xf32>
    %237 = arith.negf %236 : vector<2x128xf32>
    %238 = math.exp %237 : vector<2x128xf32>
    %cst_133 = arith.constant 1.000000e+00 : f32
    %239 = vector.broadcast %cst_133 : f32 to vector<2x128xf32>
    %240 = arith.addf %239, %238 : vector<2x128xf32>
    %241 = arith.divf %239, %240 : vector<2x128xf32>
    %242 = math.tanh %236 : vector<2x128xf32>
    %243 = vector.extract_strided_slice %241 {offsets = [0, 0], sizes = [2, 32], strides = [1, 1]} : vector<2x128xf32> to vector<2x32xf32>
    %244 = vector.extract_strided_slice %241 {offsets = [0, 32], sizes = [2, 32], strides = [1, 1]} : vector<2x128xf32> to vector<2x32xf32>
    %245 = vector.extract_strided_slice %242 {offsets = [0, 64], sizes = [2, 32], strides = [1, 1]} : vector<2x128xf32> to vector<2x32xf32>
    %246 = vector.extract_strided_slice %241 {offsets = [0, 96], sizes = [2, 32], strides = [1, 1]} : vector<2x128xf32> to vector<2x32xf32>
    %247 = arith.mulf %244, %226 : vector<2x32xf32>
    %248 = arith.mulf %243, %245 : vector<2x32xf32>
    %249 = arith.addf %247, %248 : vector<2x32xf32>
    %250 = math.tanh %249 : vector<2x32xf32>
    %251 = arith.mulf %246, %250 : vector<2x32xf32>
    %252 = vector.extract_strided_slice %251 {offsets = [0, 0], sizes = [1, 32], strides = [1, 1]} : vector<2x32xf32> to vector<1x32xf32>
    %c7_134 = arith.constant 7 : index
    %c0_135 = arith.constant 0 : index
    %253 = vector.load %arg14[%c7_134, %c0_135] : memref<16x32xf32, #tpu.memory_space<vmem>>, vector<1x32xf32>
    tpu.vector_store %arg14[%c7_134, %c0_135], %252 {strides = array<i32>} : memref<16x32xf32, #tpu.memory_space<vmem>>, vector<1x32xf32>,
    %254 = vector.extract_strided_slice %251 {offsets = [1, 0], sizes = [1, 32], strides = [1, 1]} : vector<2x32xf32> to vector<1x32xf32>
    %c15_136 = arith.constant 15 : index
    %c0_137 = arith.constant 0 : index
    %255 = vector.load %arg14[%c15_136, %c0_137] : memref<16x32xf32, #tpu.memory_space<vmem>>, vector<1x32xf32>
    tpu.vector_store %arg14[%c15_136, %c0_137], %254 {strides = array<i32>} : memref<16x32xf32, #tpu.memory_space<vmem>>, vector<1x32xf32>,
    %c0_138 = arith.constant 0 : index
    %c0_139 = arith.constant 0 : index
    %256 = vector.load %arg11[%c0_138, %c0_139] : memref<2x32xf32, #tpu.memory_space<vmem>>, vector<2x32xf32>
    tpu.vector_store %arg11[%c0_138, %c0_139], %251 {strides = array<i32>} : memref<2x32xf32, #tpu.memory_space<vmem>>, vector<2x32xf32>,
    %c0_140 = arith.constant 0 : index
    %c0_141 = arith.constant 0 : index
    %257 = vector.load %arg12[%c0_140, %c0_141] : memref<2x32xf32, #tpu.memory_space<vmem>>, vector<2x32xf32>
    tpu.vector_store %arg12[%c0_140, %c0_141], %249 {strides = array<i32>} : memref<2x32xf32, #tpu.memory_space<vmem>>, vector<2x32xf32>,
    %c0_142 = arith.constant 0 : index
    %c0_143 = arith.constant 0 : index
    %258 = vector.load %arg14[%c0_142, %c0_143] : memref<16x32xf32, #tpu.memory_space<vmem>>, vector<16x32xf32>
    %c0_144 = arith.constant 0 : index
    %c0_145 = arith.constant 0 : index
    %259 = vector.load %arg6[%c0_144, %c0_145] : memref<32x128xf32, #tpu.memory_space<vmem>>, vector<32x128xf32>
    %cst_146 = arith.constant dense<0.000000e+00> : vector<16x128xf32>
    %260 = tpu.matmul %258, %259, %cst_146 {dimension_numbers = #tpu.dot_dimension_numbers<[1], [0], [0], [1], [0, 0, 1, 1], [], []>} : vector<16x32xf32>, vector<32x128xf32>, vector<16x128xf32> -> vector<16x128xf32>
    %c0_147 = arith.constant 0 : index
    %c0_148 = arith.constant 0 : index
    %261 = vector.load %arg7[%c0_147, %c0_148] : memref<1x128xf32, #tpu.memory_space<vmem>>, vector<1x128xf32>
    %262 = vector.broadcast %261 : vector<1x128xf32> to vector<16x128xf32>
    %263 = arith.addf %260, %262 : vector<16x128xf32>
    %c0_149 = arith.constant 0 : index
    %c0_150 = arith.constant 0 : index
    %264 = vector.load %arg10[%c0_149, %c0_150] : memref<16x128xf32, #tpu.memory_space<vmem>>, vector<16x128xf32>
    tpu.vector_store %arg10[%c0_149, %c0_150], %263 {strides = array<i32>} : memref<16x128xf32, #tpu.memory_space<vmem>>, vector<16x128xf32>,
    return
  }
  func.func @transform_0(%arg0: i32, %arg1: memref<2x8xi32, #tpu.memory_space<smem>>) -> (i32, i32) {
    %c0_i32 = arith.constant 0 : i32
    %c0_i32_0 = arith.constant 0 : i32
    %c0_i32_1 = arith.constant 0 : i32
    return %c0_i32, %c0_i32_0 : i32, i32
  }
  func.func @transform_1(%arg0: i32, %arg1: memref<2x8xi32, #tpu.memory_space<smem>>) -> (i32, i32) {
    %c0_i32 = arith.constant 0 : i32
    %c0_i32_0 = arith.constant 0 : i32
    %c0_i32_1 = arith.constant 0 : i32
    return %c0_i32, %c0_i32_0 : i32, i32
  }
  func.func @transform_2(%arg0: i32, %arg1: memref<2x8xi32, #tpu.memory_space<smem>>) -> (i32, i32) {
    %c0_i32 = arith.constant 0 : i32
    %c0_i32_0 = arith.constant 0 : i32
    %c0_i32_1 = arith.constant 0 : i32
    return %c0_i32, %c0_i32_0 : i32, i32
  }
  func.func @transform_3(%arg0: i32, %arg1: memref<2x8xi32, #tpu.memory_space<smem>>) -> (i32, i32) {
    %c0_i32 = arith.constant 0 : i32
    %c0_i32_0 = arith.constant 0 : i32
    %c0_i32_1 = arith.constant 0 : i32
    return %c0_i32, %c0_i32_0 : i32, i32
  }
  func.func @transform_4(%arg0: i32, %arg1: memref<2x8xi32, #tpu.memory_space<smem>>) -> (i32, i32) {
    %c0_i32 = arith.constant 0 : i32
    %c0_i32_0 = arith.constant 0 : i32
    %c0_i32_1 = arith.constant 0 : i32
    return %c0_i32, %c0_i32_0 : i32, i32
  }
  func.func @transform_5(%arg0: i32, %arg1: memref<2x8xi32, #tpu.memory_space<smem>>) -> (i32, i32) {
    %c0_i32 = arith.constant 0 : i32
    %c0_i32_0 = arith.constant 0 : i32
    %c0_i32_1 = arith.constant 0 : i32
    return %c0_i32, %c0_i32_0 : i32, i32
  }
  func.func @transform_6(%arg0: i32, %arg1: memref<2x8xi32, #tpu.memory_space<smem>>) -> (i32, i32) {
    %c0_i32 = arith.constant 0 : i32
    %c0_i32_0 = arith.constant 0 : i32
    %c0_i32_1 = arith.constant 0 : i32
    return %c0_i32, %c0_i32_0 : i32, i32
  }
  func.func @transform_7(%arg0: i32, %arg1: memref<2x8xi32, #tpu.memory_space<smem>>) -> (i32, i32) {
    %c0_i32 = arith.constant 0 : i32
    %c0_i32_0 = arith.constant 0 : i32
    %c0_i32_1 = arith.constant 0 : i32
    return %c0_i32, %c0_i32_0 : i32, i32
  }
  func.func @transform_8(%arg0: i32, %arg1: memref<2x8xi32, #tpu.memory_space<smem>>) -> (i32, i32) {
    %c0_i32 = arith.constant 0 : i32
    %c0_i32_0 = arith.constant 0 : i32
    %c0_i32_1 = arith.constant 0 : i32
    return %c0_i32, %c0_i32_0 : i32, i32
  }
  func.func @transform_9(%arg0: i32, %arg1: memref<2x8xi32, #tpu.memory_space<smem>>) -> (i32, i32) {
    %c0_i32 = arith.constant 0 : i32
    %c0_i32_0 = arith.constant 0 : i32
    %c0_i32_1 = arith.constant 0 : i32
    return %c0_i32, %c0_i32_0 : i32, i32
  }
  func.func @transform_10(%arg0: i32, %arg1: memref<2x8xi32, #tpu.memory_space<smem>>) -> (i32, i32) {
    %c0_i32 = arith.constant 0 : i32
    %c0_i32_0 = arith.constant 0 : i32
    %c0_i32_1 = arith.constant 0 : i32
    return %c0_i32, %c0_i32_0 : i32, i32
  }
}

</mosaic_0001>

<bundles_post_ra>
// kernel: rnnlm_forward.1
= control target key start
LH: loop header
LB: loop body
LE: loop exit
PB: predicated region body
PF: predicated region fallthrough
CT: control target
= control target key end

     0   :  { %s2117_s0 = inlined_call_operand.vmem [shape: s32[2,8], index: 0, kind: input, shape index: {}]   ;;  %s2118_s1 = inlined_call_operand.vmem [shape: f32[64,32], index: 1, kind: input, shape index: {}]   ;;  %s2119_s2 = inlined_call_operand.vmem [shape: f32[32,128], index: 2, kind: input, shape index: {}]   ;;  %s2120_s3 = inlined_call_operand.vmem [shape: f32[32,128], index: 3, kind: input, shape index: {}]   ;;  %s2121_s4 = inlined_call_operand.vmem [shape: f32[1,128], index: 4, kind: input, shape index: {}]   ;;  %s2122_s5 = inlined_call_operand.vmem [shape: f32[32,128], index: 5, kind: input, shape index: {}]   ;;  %s2123_s6 = inlined_call_operand.vmem [shape: f32[1,128], index: 6, kind: input, shape index: {}]   ;;  %s2124_s7 = inlined_call_operand.vmem [shape: f32[2,32], index: 7, kind: input, shape index: {}]   ;;  %s2125_s8 = inlined_call_operand.vmem [shape: f32[2,32], index: 8, kind: input, shape index: {}]   ;;  %s2126_s9 = inlined_call_operand.hbm [shape: f32[16,128], index: 9, kind: output, shape index: {0}]   ;;  %s2127_s10 = inlined_call_operand.hbm [shape: f32[2,32], index: 10, kind: output, shape index: {1}]   ;;  %s2128_s11 = inlined_call_operand.hbm [shape: f32[2,32], index: 11, kind: output, shape index: {2}]  }
   0x1   :  { %s17_s19 = sshll.u32 %s2117_s0, 4  ;;  %s18_s19 = int_to_ptr.vmem [resolvable:$true] %s17_s19 }
   0x2   :  { %s1626_s20 = scalar_lea.vmem %s18_s19, 32  ;;  %p1631_p1 = scmp.lt.s32.totalorder %s18_s19, %s18_s19 }
   0x3   :  { %p1627_p0 = scmp.ne.s32.totalorder %s18_s19, %s1626_s20  ;;  %p1632_p2 = scmp.lt.s32.totalorder %s1626_s20, %s1626_s20 }
   0x5   :  { %p1633_p3 = por %p1632_p2, %p1631_p1 }
   0x7   :  { %p1634_p4 = pnand %p1633_p3, %p1627_p0 }
   0x9   :  { %1637 = shalt.err (!%p1634_p4)  }
   0xa   :  { %s1710_s21 = smov [#allocation5]  }
   0xb   :  { %20 = dma.vmem_to_smem %s18_s19, 32, %s1710_s21, [#allocation4] }
   0xc   :  { %1704 = dma.done.wait [#allocation4], 32 }
   0xd   :  { %1705 = vsyncadd [#allocation4], 4294967264 }
   0xe   :  { %22 = sfence }
   0xf   :  { %23 = vsyncpa [#allocation7], 0  ;;  %v108_v0 = vld [vmem:[%s2119_s2] sm:$0xff]  ;;  %v109_v1 = vld [vmem:[%s2119_s2 + $0x8] sm:$0xff]  ;;  %s1794_s27 = sld [smem:[#allocation5]]  ;;  %v1711_v4 = vmov 0.0|0.0  }
  0x10   :  { %v203_v2 = vld [vmem:[%s2120_s3] sm:$0xff]  ;;  %v1486_v3 = vpack.c.bf16 %v109_v1, %v108_v0  ;;  %1494 = vmatprep.subr.bf16.mxu1 %v1711_v4  ;;  %v204_v5 = vld [vmem:[%s2120_s3 + $0x8] sm:$0xff]  ;;  %v110_v6 = vld [vmem:[%s2119_s2 + $0x10] sm:$0xff]  ;;  %s1806_s15 = sld [smem:[#allocation5 + $0x80]]  ;;  %s1810_s16 = sld [smem:[#allocation5 + $0x1]]  ;;  %vm44_vm0 = vcmask 253952  }
  0x11   :  { %v111_v7 = vld [vmem:[%s2119_s2 + $0x18] sm:$0xff]  ;;  %v1808_v8 = vpack.c.bf16 %v204_v5, %v203_v2  ;;  %s1812_s17 = sld [smem:[#allocation5 + $0x81]]  ;;  %v205_v10 = vld [vmem:[%s2120_s3 + $0x10] sm:$0xff]  ;;  %s1817_s20 = sld [smem:[#allocation5 + $0x2]]  ;;  %vm1712_vm1 = vmmov 0   ;;  %v1713_v13 = vmov 0.0  }
  0x12   :  { %v1490_v9 = vpack.c.bf16 %v111_v7, %v110_v6  ;;  %1487 = vmatprep.subr.bf16.mxu0 %v1486_v3  ;;  %s1819_s21 = sld [smem:[#allocation5 + $0x82]]  ;;  %v206_v11 = vld [vmem:[%s2120_s3 + $0x18] sm:$0xff]  ;;  %s1825_s23 = sld [smem:[#allocation5 + $0x3]]  ;;  %1395 = vmatprep.mubr.msk.f32.mxu1 %vm1712_vm1, %v1713_v13 }
  0x13   :  { %1489 = vmatpush3.bf16.msra.mxu0 %v1486_v3  ;;  %1496 = vmatpush3.bf16.msra.mxu1 %v1808_v8  ;;  %s1827_s24 = sld [smem:[#allocation5 + $0x83]]  ;;  %v1829_v12 = vpack.c.bf16 %v206_v11, %v205_v10  ;;  %s1832_s0 = sld [smem:[#allocation5 + $0x4]] }
  0x14   :  { %1491 = vmatprep.subr.bf16.mxu0 %v1490_v9  ;;  %1497 = vmatprep.subr.bf16.mxu1 %v1711_v4  ;;  %s1834_s25 = sld [smem:[#allocation5 + $0x84]]  ;;  %s1840_s29 = sld [smem:[#allocation5 + $0x5]] }
  0x15   :  { %s42_s3 = scalar_lea.vmem %s2118_s1, %s1794_s27 }
  0x16   :  { %24 = vsyncpa [#allocation9], 0  ;;  %v43_v14 = vld [vmem:[%s42_s3] sm:$0x1]  ;;  %s47_s13 = scalar_lea.vmem %s2118_s1, %s1806_s15  ;;  %s1848_s14 = sld [smem:[#allocation5 + $0x85]]  ;;  %vm119_vm2 = vcmask 261120  }
  0x17   :  { %1493 = vmatpush3.bf16.msra.mxu0 %v1490_v9  ;;  %45 = vst.msk [vmem:[#allocation2] sm:$0x1] %vm44_vm0, %v43_v14  ;;  %v48_v15 = vld [vmem:[%s47_s13] sm:$0x1]  ;;  %s51_s19 = scalar_lea.vmem %s2118_s1, %s1810_s16  ;;  %s55_s26 = scalar_lea.vmem %s2118_s1, %s1812_s17  ;;  %1499 = vmatpush3.bf16.msra.mxu1 %v1829_v12  ;;  %vm314_vm3 = vcmask 254977   ;;  %vm427_vm4 = vcmask 256002  }
  0x18   :  { %v201_v16 = vld [vmem:[%s2124_s7] sm:$0x3]  ;;  %49 = vst.msk [vmem:[#allocation2 + $0x1] sm:$0x1] %vm44_vm0, %v48_v15  ;;  %s59_s16 = scalar_lea.vmem %s2118_s1, %s1817_s20  ;;  %s63_s17 = scalar_lea.vmem %s2118_s1, %s1819_s21  ;;  %1500 = vmatprep.subr.bf16.mxu0 %v1711_v4  ;;  %1506 = vmatprep.subr.bf16.mxu1 %v1711_v4  ;;  %vm429_vm5 = vcmask 257027   ;;  %vm663_vm6 = vcmask 260102  }
  0x19   :  { %v52_v17 = vld [vmem:[%s51_s19] sm:$0x1]  ;;  %s67_s20 = scalar_lea.vmem %s2118_s1, %s1825_s23  ;;  %s71_s2 = scalar_lea.vmem %s2118_s1, %s1827_s24  ;;  %vm665_vm7 = vcmask 261127   ;;  %vm545_vm8 = vcmask 258052   ;;  %vm547_vm9 = vcmask 259077   ;;  %vm1125_vm10 = vcmask 261126  }
  0x1a   :  { %v56_v18 = vld [vmem:[%s55_s26] sm:$0x1]  ;;  %53 = vst.msk [vmem:[#allocation2 + $0x2] sm:$0x1] %vm44_vm0, %v52_v17  ;;  %s75_s26 = scalar_lea.vmem %s2118_s1, %s1832_s0  ;;  %s79_s23 = scalar_lea.vmem %s2118_s1, %s1834_s25  ;;  %1396 = vmatmul.mubr.msk.f32.vlgmr.msra.gmra.mrb[0].mxu1 %vm119_vm2, %v201_v16 }
  0x1b   :  { %57 = vst.msk [vmem:[#allocation2 + $0x3] sm:$0x1] %vm44_vm0, %v56_v18  ;;  %v60_v19 = vld [vmem:[%s59_s16] sm:$0x1]  ;;  %s83_s30 = scalar_lea.vmem %s2118_s1, %s1840_s29  ;;  %s1298_s16 = sld [smem:[#allocation5 + $0x6]]  ;;  %1508 = vmatpush3.bf16.msra.mxu1 %v1808_v8  ;;  %1417 = vmatprep.mubr.msk.f32.mxu1 %vm1712_vm1, %v1713_v13 }
  0x1c   :  { %v64_v20 = vld [vmem:[%s63_s17] sm:$0x1]  ;;  %61 = vst.msk [vmem:[#allocation2 + $0x4] sm:$0x1] %vm44_vm0, %v60_v19  ;;  %s87_s12 = scalar_lea.vmem %s2118_s1, %s1848_s14  ;;  %s1299_s13 = sld [smem:[#allocation5 + $0x86]]  ;;  %1509 = vmatprep.subr.bf16.mxu1 %v1711_v4 }
  0x1d   :  { %65 = vst.msk [vmem:[#allocation2 + $0x5] sm:$0x1] %vm44_vm0, %v64_v20  ;;  %v68_v21 = vld [vmem:[%s67_s20] sm:$0x1]  ;;  %s1300_s29 = sld [smem:[#allocation5 + $0x7]]  ;;  %s1714_s24 = smov 64  }
  0x1e   :  { %v72_v22 = vld [vmem:[%s71_s2] sm:$0x1]  ;;  %69 = vst.msk [vmem:[#allocation2 + $0x6] sm:$0x1] %vm44_vm0, %v68_v21  ;;  %s1301_s17 = sld [smem:[#allocation5 + $0x87]] }
  0x1f   :  { %73 = vst.msk [vmem:[#allocation2 + $0x7] sm:$0x1] %vm44_vm0, %v72_v22  ;;  %v76_v23 = vld [vmem:[%s75_s26] sm:$0x1]  ;;  %1511 = vmatpush3.bf16.msra.mxu1 %v1829_v12 }
  0x20   :  { %v80_v24 = vld [vmem:[%s79_s23] sm:$0x1]  ;;  %77 = vst.msk [vmem:[#allocation2 + $0x8] sm:$0x1] %vm44_vm0, %v76_v23  ;;  %1518 = vmatprep.subr.bf16.mxu1 %v1711_v4 }
  0x21   :  { %81 = vst.msk [vmem:[#allocation2 + $0x9] sm:$0x1] %vm44_vm0, %v80_v24  ;;  %v84_v25 = vld [vmem:[%s83_s30] sm:$0x1]  ;;  %s91_s20 = scalar_lea.vmem %s2118_s1, %s1298_s16  ;;  %s1715_s16 = smov 32  }
  0x22   :  { %85 = vst.msk [vmem:[#allocation2 + $0xa] sm:$0x1] %vm44_vm0, %v84_v25  ;;  %v88_v26 = vld [vmem:[%s87_s12] sm:$0x1]  ;;  %s95_s19 = scalar_lea.vmem %s2118_s1, %s1299_s13 }
  0x23   :  { %89 = vst.msk [vmem:[#allocation2 + $0xb] sm:$0x1] %vm44_vm0, %v88_v26  ;;  %v92_v28 = vld [vmem:[%s91_s20] sm:$0x1]  ;;  %s99_s22 = scalar_lea.vmem %s2118_s1, %s1300_s29 }
  0x24   :  { %93 = vst.msk [vmem:[#allocation2 + $0xc] sm:$0x1] %vm44_vm0, %v92_v28  ;;  %v96_v29 = vld [vmem:[%s95_s19] sm:$0x1]  ;;  %s103_s15 = scalar_lea.vmem %s2118_s1, %s1301_s17 }
  0x25   :  { %97 = vst.msk [vmem:[#allocation2 + $0xd] sm:$0x1] %vm44_vm0, %v96_v29  ;;  %v100_v30 = vld [vmem:[%s99_s22] sm:$0x1] }
  0x26   :  { %v106_v27 = vld [vmem:[#allocation2] sm:$0xff]  ;;  %101 = vst.msk [vmem:[#allocation2 + $0xe] sm:$0x1] %vm44_vm0, %v100_v30 }
  0x27   :  { %1384 = vmatprep.mubr.msk.f32.mxu0 %vm119_vm2, %v106_v27  ;;  %v104_v31 = vld [vmem:[%s103_s15] sm:$0x1] }
  0x28   :  { %105 = vst.msk [vmem:[#allocation2 + $0xf] sm:$0x1] %vm44_vm0, %v104_v31  ;;  %v1302_v35 = vld [vmem:[%s2121_s4] ss:$0 sm:$0xff]  ;;  %s1716_s4 = smov 96  }
  0x29   :  { %v202_v42 = vld [vmem:[%s2125_s8] sm:$0x3] }
  0x2f   :  { %v107_v32 = vld [vmem:[#allocation2 + $0x8] sm:$0xff] }
  0x30   :  { %1385 = vmatmul.mubr.msk.f32.vlgmr.msra.gmra.mrb[0].mxu0 %vm119_vm2, %v107_v32 }
  0x31   :  { %1502 = vmatpush3.bf16.msra.mxu0 %v1808_v8  ;;  %1406 = vmatprep.mubr.msk.f32.mxu0 %vm1712_vm1, %v1713_v13 }
  0x32   :  { %1503 = vmatprep.subr.bf16.mxu0 %v1711_v4 }
  0x35   :  { %1505 = vmatpush3.bf16.msra.mxu0 %v1829_v12 }
  0x36   :  { %1512 = vmatprep.subr.bf16.mxu0 %v1711_v4 }
  0xed   :  { %v276_v33 = vpop.f32.mrb[0].mxu1 }
  0xee   :  { %v1397_v34 = vpop.f32.mrb[1].mxu1 }
 0x103   :  { %v1386_v36 = vpop.f32.mrb[0].mxu0 }
 0x104   :  { %v1942_v37 = vadd.f32 %v1386_v36, %v1302_v35  ;;  %v192_v38 = vpop.f32.mrb[1].mxu0 }
 0x105   :  { %v1944_v39 = vadd.f32 %v1302_v35, %v192_v38 }
 0x107   :  { %v280_v40 = vadd.f32 %v276_v33, %v1944_v39 }
 0x109   :  { %1562 = vtanh.f32 %v280_v40  ;;  %v1306_v43 = vmul.f32 -1.442695, %v280_v40 }
 0x10b   :  { %1564 = vpow2.f32 %v1306_v43 }
 0x113   :  { %v1563_v41 = vpop.eup %1562 }
 0x114   :  { %294 = vrot.lane.b32.xlu0 %v1563_v41, %s1714_s24 }
 0x115   :  { %v1565_v44 = vpop.eup %1564 }
 0x116   :  { %v284_v45 = vadd.f32 1.0, %v1565_v44 }
 0x118   :  { %289 = vrot.lane.b32.xlu0 %v202_v42, %s1715_s16  ;;  %1566 = vrcp.f32 %v284_v45 }
 0x122   :  { %v1567_v46 = vpop.eup %1566 }
 0x186   :  { %v295_v47 = vpop.permute.xlu0 %294 }
 0x187   :  { %v297_v48 = vmul.f32 %v1567_v46, %v295_v47 }
 0x189   :  { %299 = vrot.lane.b32.xlu1 %v297_v48, %s1715_s16 }
 0x18a   :  { %v290_v49 = vpop.permute.xlu0 %289 }
 0x18b   :  { %v292_v50 = vmul.f32 %v1567_v46, %v290_v49 }
 0x1fb   :  { %v300_v51 = vpop.permute.xlu1 %299 }
 0x1fc   :  { %v302_v52 = vadd.f32 %v300_v51, %v292_v50 }
 0x1fe   :  { %1568 = vtanh.f32 %v302_v52  ;;  %v404_v5 = vrot.slane %v302_v52, 6 }
 0x208   :  { %v1569_v53 = vpop.eup %1568 }
 0x209   :  { %305 = vrot.lane.b32.xlu1 %v1569_v53, %s1714_s24 }
 0x27b   :  { %v306_v54 = vpop.permute.xlu1 %305 }
 0x27c   :  { %v308_v55 = vmul.f32 %v1567_v46, %v306_v54 }
 0x27e   :  { %310 = vrot.lane.b32.xlu0 %v308_v55, %s1715_s16 }
 0x2f0   :  { %v311_v56 = vpop.permute.xlu0 %310 }
 0x2f1   :  { %313 = vst.msk [vmem:[#allocation3] sm:$0x1] %vm44_vm0, %v311_v56  ;;  %1407 = vmatmul.mubr.msk.f32.vlgmr.msra.gmra.mrb[2].mxu0 %vm119_vm2, %v311_v56 }
 0x2f2   :  { %315 = vst.msk [vmem:[#allocation3 + $0x7] sm:$0x2] %vm314_vm3, %v311_v56  ;;  %1514 = vmatpush3.bf16.msra.mxu0 %v1808_v8  ;;  %1428 = vmatprep.mubr.msk.f32.mxu0 %vm1712_vm1, %v1713_v13 }
 0x2f3   :  { %1515 = vmatprep.subr.bf16.mxu0 %v1711_v4 }
 0x2f6   :  { %1517 = vmatpush3.bf16.msra.mxu0 %v1829_v12 }
 0x2f7   :  { %1524 = vmatprep.subr.bf16.mxu0 %v1711_v4 }
 0x3c4   :  { %v388_v57 = vpop.f32.mrb[2].mxu0 }
 0x3c5   :  { %v393_v58 = vrot.slane %v388_v57, 6  ;;  %v1408_v59 = vpop.f32.mrb[3].mxu0 }
 0x3c7   :  { %v395_v60 = vadd.f32 %v393_v58, %v1944_v39 }
 0x3c9   :  { %1570 = vtanh.f32 %v395_v60  ;;  %v1308_v62 = vmul.f32 -1.442695, %v395_v60 }
 0x3cb   :  { %1572 = vpow2.f32 %v1308_v62 }
 0x3d3   :  { %v1571_v61 = vpop.eup %1570 }
 0x3d4   :  { %408 = vrot.lane.b32.xlu1 %v1571_v61, %s1714_s24 }
 0x3d5   :  { %v1573_v63 = vpop.eup %1572 }
 0x3d6   :  { %v399_v0 = vadd.f32 1.0, %v1573_v63 }
 0x3d8   :  { %1574 = vrcp.f32 %v399_v0 }
 0x3e2   :  { %v1575_v1 = vpop.eup %1574 }
 0x3e3   :  { %v406_v6 = vmul.f32 %v1575_v1, %v404_v5 }
 0x446   :  { %v409_v2 = vpop.permute.xlu1 %408 }
 0x447   :  { %v411_v3 = vmul.f32 %v1575_v1, %v409_v2 }
 0x449   :  { %413 = vrot.lane.b32.xlu0 %v411_v3, %s1715_s16 }
 0x4bb   :  { %v414_v7 = vpop.permute.xlu0 %413 }
 0x4bc   :  { %v416_v9 = vadd.f32 %v414_v7, %v406_v6 }
 0x4be   :  { %1576 = vtanh.f32 %v416_v9  ;;  %v522_v28 = vrot.slane %v416_v9, 6 }
 0x4c8   :  { %v1577_v10 = vpop.eup %1576 }
 0x4c9   :  { %419 = vrot.lane.b32.xlu1 %v1577_v10, %s1714_s24 }
 0x53b   :  { %v420_v11 = vpop.permute.xlu1 %419 }
 0x53c   :  { %v1968_v14 = vmul.f32 %v1575_v1, %v420_v11 }
 0x53e   :  { %v435_v15 = vrot.slane %v1968_v14, 2 }
 0x540   :  { %436 = vrot.lane.b32.xlu0 %v435_v15, %s1715_s16 }
 0x5b2   :  { %v437_v16 = vpop.permute.xlu0 %436 }
 0x5b3   :  { %1418 = vmatmul.mubr.msk.f32.vlgmr.msra.gmra.mrb[2].mxu1 %vm119_vm2, %v437_v16 }
 0x5b4   :  { %1520 = vmatpush3.bf16.msra.mxu1 %v1808_v8  ;;  %1439 = vmatprep.mubr.msk.f32.mxu1 %vm1712_vm1, %v1713_v13 }
 0x5b5   :  { %1521 = vmatprep.subr.bf16.mxu1 %v1711_v4 }
 0x5b8   :  { %1523 = vmatpush3.bf16.msra.mxu1 %v1829_v12 }
 0x5b9   :  { %1530 = vmatprep.subr.bf16.mxu1 %v1711_v4 }
 0x686   :  { %v506_v17 = vpop.f32.mrb[2].mxu1 }
 0x687   :  { %v511_v18 = vrot.slane %v506_v17, 4  ;;  %v1419_v19 = vpop.f32.mrb[3].mxu1 }
 0x689   :  { %v513_v20 = vadd.f32 %v511_v18, %v1944_v39 }
 0x68b   :  { %1578 = vtanh.f32 %v513_v20  ;;  %v1310_v22 = vmul.f32 -1.442695, %v513_v20 }
 0x68d   :  { %1580 = vpow2.f32 %v1310_v22 }
 0x695   :  { %v1579_v21 = vpop.eup %1578 }
 0x696   :  { %526 = vrot.lane.b32.xlu1 %v1579_v21, %s1714_s24 }
 0x697   :  { %v1581_v23 = vpop.eup %1580 }
 0x698   :  { %v517_v24 = vadd.f32 1.0, %v1581_v23 }
 0x69a   :  { %1582 = vrcp.f32 %v517_v24 }
 0x6a4   :  { %v1583_v25 = vpop.eup %1582 }
 0x6a5   :  { %v524_v29 = vmul.f32 %v1583_v25, %v522_v28 }
 0x708   :  { %v527_v26 = vpop.permute.xlu1 %526 }
 0x709   :  { %v529_v27 = vmul.f32 %v1583_v25, %v527_v26 }
 0x70b   :  { %531 = vrot.lane.b32.xlu0 %v529_v27, %s1715_s16 }
 0x77d   :  { %v532_v30 = vpop.permute.xlu0 %531 }
 0x77e   :  { %v534_v31 = vadd.f32 %v532_v30, %v524_v29 }
 0x780   :  { %1584 = vtanh.f32 %v534_v31  ;;  %v640_v50 = vrot.slane %v534_v31, 6 }
 0x78a   :  { %v1585_v32 = vpop.eup %1584 }
 0x78b   :  { %537 = vrot.lane.b32.xlu1 %v1585_v32, %s1714_s24 }
 0x7fd   :  { %v538_v33 = vpop.permute.xlu1 %537 }
 0x7fe   :  { %v1983_v34 = vmul.f32 %v1583_v25, %v538_v33 }
 0x800   :  { %v553_v35 = vrot.slane %v1983_v34, 4 }
 0x802   :  { %554 = vrot.lane.b32.xlu0 %v553_v35, %s1715_s16 }
 0x874   :  { %v555_v36 = vpop.permute.xlu0 %554 }
 0x875   :  { %1429 = vmatmul.mubr.msk.f32.vlgmr.msra.gmra.mrb[4].mxu0 %vm119_vm2, %v555_v36 }
 0x876   :  { %1526 = vmatpush3.bf16.msra.mxu0 %v1808_v8  ;;  %1450 = vmatprep.mubr.msk.f32.mxu0 %vm1712_vm1, %v1713_v13 }
 0x877   :  { %1527 = vmatprep.subr.bf16.mxu0 %v1711_v4 }
 0x87a   :  { %1529 = vmatpush3.bf16.msra.mxu0 %v1829_v12 }
 0x87b   :  { %1536 = vmatprep.subr.bf16.mxu0 %v1711_v4 }
 0x948   :  { %v624_v38 = vpop.f32.mrb[4].mxu0 }
 0x949   :  { %v629_v40 = vrot.slane %v624_v38, 2  ;;  %v1430_v41 = vpop.f32.mrb[5].mxu0 }
 0x94b   :  { %v631_v42 = vadd.f32 %v629_v40, %v1944_v39 }
 0x94d   :  { %1586 = vtanh.f32 %v631_v42  ;;  %v1312_v44 = vmul.f32 -1.442695, %v631_v42 }
 0x94f   :  { %1588 = vpow2.f32 %v1312_v44 }
 0x957   :  { %v1587_v43 = vpop.eup %1586 }
 0x958   :  { %644 = vrot.lane.b32.xlu1 %v1587_v43, %s1714_s24 }
 0x959   :  { %v1589_v45 = vpop.eup %1588 }
 0x95a   :  { %v635_v46 = vadd.f32 1.0, %v1589_v45 }
 0x95c   :  { %1590 = vrcp.f32 %v635_v46 }
 0x966   :  { %v1591_v47 = vpop.eup %1590 }
 0x967   :  { %v642_v51 = vmul.f32 %v1591_v47, %v640_v50 }
 0x9ca   :  { %v645_v48 = vpop.permute.xlu1 %644 }
 0x9cb   :  { %v647_v49 = vmul.f32 %v1591_v47, %v645_v48 }
 0x9cd   :  { %649 = vrot.lane.b32.xlu0 %v647_v49, %s1715_s16 }
 0xa3f   :  { %v650_v52 = vpop.permute.xlu0 %649 }
 0xa40   :  { %v652_v53 = vadd.f32 %v650_v52, %v642_v51 }
 0xa42   :  { %1592 = vtanh.f32 %v652_v53  ;;  %v755_v5 = vrot.slane %v652_v53, 6 }
 0xa4c   :  { %v1593_v39 = vpop.eup %1592 }
 0xa4d   :  { %655 = vrot.lane.b32.xlu1 %v1593_v39, %s1714_s24 }
 0xabf   :  { %v656_v54 = vpop.permute.xlu1 %655 }
 0xac0   :  { %v1998_v55 = vmul.f32 %v1591_v47, %v656_v54 }
 0xac2   :  { %v671_v56 = vrot.slane %v1998_v55, 6 }
 0xac4   :  { %672 = vrot.lane.b32.xlu0 %v671_v56, %s1715_s16 }
 0xb36   :  { %v673_v57 = vpop.permute.xlu0 %672 }
 0xb37   :  { %1440 = vmatmul.mubr.msk.f32.vlgmr.msra.gmra.mrb[4].mxu1 %vm119_vm2, %v673_v57 }
 0xb38   :  { %1532 = vmatpush3.bf16.msra.mxu1 %v1808_v8  ;;  %1461 = vmatprep.mubr.msk.f32.mxu1 %vm1712_vm1, %v1713_v13 }
 0xb39   :  { %1533 = vmatprep.subr.bf16.mxu1 %v1711_v4 }
 0xb3c   :  { %1535 = vmatpush3.bf16.msra.mxu1 %v1829_v12 }
 0xc0a   :  { %v742_v58 = vpop.f32.mrb[4].mxu1 }
 0xc0b   :  { %v746_v59 = vadd.f32 %v742_v58, %v1942_v37  ;;  %v1441_v60 = vpop.f32.mrb[5].mxu1 }
 0xc0d   :  { %1594 = vtanh.f32 %v746_v59  ;;  %v1314_v62 = vmul.f32 -1.442695, %v746_v59 }
 0xc0f   :  { %1596 = vpow2.f32 %v1314_v62 }
 0xc17   :  { %v1595_v61 = vpop.eup %1594 }
 0xc18   :  { %759 = vrot.lane.b32.xlu1 %v1595_v61, %s1714_s24 }
 0xc19   :  { %v1597_v63 = vpop.eup %1596 }
 0xc1a   :  { %v750_v0 = vadd.f32 1.0, %v1597_v63 }
 0xc1c   :  { %1598 = vrcp.f32 %v750_v0 }
 0xc26   :  { %v1599_v1 = vpop.eup %1598 }
 0xc27   :  { %v757_v6 = vmul.f32 %v1599_v1, %v755_v5 }
 0xc8a   :  { %v760_v2 = vpop.permute.xlu1 %759 }
 0xc8b   :  { %v762_v3 = vmul.f32 %v1599_v1, %v760_v2 }
 0xc8d   :  { %764 = vrot.lane.b32.xlu0 %v762_v3, %s1715_s16 }
 0xcff   :  { %v765_v7 = vpop.permute.xlu0 %764 }
 0xd00   :  { %v767_v9 = vadd.f32 %v765_v7, %v757_v6 }
 0xd02   :  { %1600 = vtanh.f32 %v767_v9 }
 0xd0c   :  { %v1601_v10 = vpop.eup %1600 }
 0xd0d   :  { %770 = vrot.lane.b32.xlu1 %v1601_v10, %s1714_s24  ;;  %v1134_v10 = vld [vmem:[%s2122_s5] sm:$0xff] }
 0xd7f   :  { %v771_v11 = vpop.permute.xlu1 %770 }
 0xd80   :  { %v773_v15 = vmul.f32 %v1599_v1, %v771_v11  ;;  %v1135_v11 = vld [vmem:[%s2122_s5 + $0x8] sm:$0xff] }
 0xd82   :  { %775 = vrot.lane.b32.xlu0 %v773_v15, %s1715_s16 }
 0xdf4   :  { %v776_v16 = vpop.permute.xlu0 %775 }
 0xdf5   :  { %778 = vst.msk [vmem:[#allocation3 + $0x4] sm:$0x1] %vm44_vm0, %v776_v16  ;;  %1451 = vmatmul.mubr.msk.f32.vlgmr.msra.gmra.mrb[6].mxu0 %vm119_vm2, %v776_v16 }
 0xdf6   :  { %779 = vst.msk [vmem:[#allocation3 + $0xb] sm:$0x2] %vm314_vm3, %v776_v16  ;;  %1538 = vmatpush3.bf16.msra.mxu0 %v1808_v8  ;;  %1472 = vmatprep.mubr.msk.f32.mxu0 %vm1712_vm1, %v1713_v13  ;;  %v1542_v16 = vpack.c.bf16 %v1135_v11, %v1134_v10 }
 0xdf7   :  { %1539 = vmatprep.subr.bf16.mxu0 %v1711_v4  ;;  %v868_v4 = vrot.slane %v767_v9, 6 }
 0xdf8   :  { %1543 = vmatprep.subr.bf16.mxu1 %v1542_v16 }
 0xdfa   :  { %1541 = vmatpush3.bf16.msra.mxu0 %v1829_v12 }
 0xec8   :  { %v852_v17 = vpop.f32.mrb[6].mxu0 }
 0xec9   :  { %v857_v18 = vrot.slane %v852_v17, 6  ;;  %v1452_v19 = vpop.f32.mrb[7].mxu0  ;;  %v1137_v17 = vld [vmem:[%s2122_s5 + $0x18] sm:$0xff] }
 0xecb   :  { %v859_v20 = vadd.f32 %v857_v18, %v1942_v37 }
 0xecd   :  { %1602 = vtanh.f32 %v859_v20  ;;  %v1316_v22 = vmul.f32 -1.442695, %v859_v20 }
 0xecf   :  { %1604 = vpow2.f32 %v1316_v22 }
 0xed7   :  { %v1603_v21 = vpop.eup %1602 }
 0xed8   :  { %872 = vrot.lane.b32.xlu1 %v1603_v21, %s1714_s24 }
 0xed9   :  { %v1605_v23 = vpop.eup %1604 }
 0xeda   :  { %v863_v8 = vadd.f32 1.0, %v1605_v23 }
 0xedc   :  { %1606 = vrcp.f32 %v863_v8 }
 0xee6   :  { %v1607_v24 = vpop.eup %1606 }
 0xee7   :  { %v870_v12 = vmul.f32 %v1607_v24, %v868_v4 }
 0xf4a   :  { %v873_v13 = vpop.permute.xlu1 %872 }
 0xf4b   :  { %v875_v25 = vmul.f32 %v1607_v24, %v873_v13 }
 0xf4d   :  { %877 = vrot.lane.b32.xlu0 %v875_v25, %s1715_s16 }
 0xfbf   :  { %v878_v26 = vpop.permute.xlu0 %877 }
 0xfc0   :  { %v880_v27 = vadd.f32 %v878_v26, %v870_v12 }
 0xfc2   :  { %1608 = vtanh.f32 %v880_v27  ;;  %v984_v47 = vrot.slane %v880_v27, 6 }
 0xfcc   :  { %v1609_v28 = vpop.eup %1608 }
 0xfcd   :  { %883 = vrot.lane.b32.xlu1 %v1609_v28, %s1714_s24 }
0x103f   :  { %v884_v29 = vpop.permute.xlu1 %883 }
0x1040   :  { %v2025_v30 = vmul.f32 %v1607_v24, %v884_v29 }
0x1042   :  { %v897_v31 = vrot.slane %v2025_v30, 2 }
0x1044   :  { %898 = vrot.lane.b32.xlu0 %v897_v31, %s1715_s16 }
0x10b6   :  { %v899_v32 = vpop.permute.xlu0 %898 }
0x10b7   :  { %1462 = vmatmul.mubr.msk.f32.vlgmr.msra.gmra.mrb[6].mxu1 %vm119_vm2, %v899_v32 }
0x10b8   :  { %1545 = vmatpush3.bf16.msra.mxu1 %v1542_v16 }
0x118a   :  { %v968_v33 = vpop.f32.mrb[6].mxu1 }
0x118b   :  { %v973_v35 = vrot.slane %v968_v33, 4  ;;  %v1463_v36 = vpop.f32.mrb[7].mxu1 }
0x118d   :  { %v975_v38 = vadd.f32 %v973_v35, %v1942_v37 }
0x118f   :  { %1610 = vtanh.f32 %v975_v38  ;;  %v1318_v41 = vmul.f32 -1.442695, %v975_v38 }
0x1191   :  { %1612 = vpow2.f32 %v1318_v41 }
0x1199   :  { %v1611_v40 = vpop.eup %1610 }
0x119a   :  { %988 = vrot.lane.b32.xlu1 %v1611_v40, %s1714_s24 }
0x119b   :  { %v1613_v42 = vpop.eup %1612 }
0x119c   :  { %v979_v43 = vadd.f32 1.0, %v1613_v42 }
0x119e   :  { %1614 = vrcp.f32 %v979_v43 }
0x11a8   :  { %v1615_v44 = vpop.eup %1614 }
0x11a9   :  { %v986_v48 = vmul.f32 %v1615_v44, %v984_v47 }
0x120c   :  { %v989_v45 = vpop.permute.xlu1 %988 }
0x120d   :  { %v991_v46 = vmul.f32 %v1615_v44, %v989_v45 }
0x120f   :  { %993 = vrot.lane.b32.xlu0 %v991_v46, %s1715_s16 }
0x1281   :  { %v994_v49 = vpop.permute.xlu0 %993 }
0x1282   :  { %v996_v50 = vadd.f32 %v994_v49, %v986_v48 }
0x1284   :  { %1616 = vtanh.f32 %v996_v50 }
0x128e   :  { %v1617_v51 = vpop.eup %1616 }
0x128f   :  { %999 = vrot.lane.b32.xlu1 %v1617_v51, %s1714_s24 }
0x1301   :  { %v1000_v52 = vpop.permute.xlu1 %999 }
0x1302   :  { %v1002_v53 = vmul.f32 %v1615_v44, %v1000_v52 }
0x1304   :  { %v1013_v39 = vrot.slane %v1002_v53, 4 }
0x1306   :  { %1014 = vrot.lane.b32.xlu0 %v1013_v39, %s1715_s16 }
0x1378   :  { %v1015_v54 = vpop.permute.xlu0 %1014 }
0x1379   :  { %1473 = vmatmul.mubr.msk.f32.vlgmr.msra.gmra.mrb[8].mxu0 %vm119_vm2, %v1015_v54 }
0x144c   :  { %v1084_v56 = vpop.f32.mrb[8].mxu0 }
0x144d   :  { %v1089_v57 = vrot.slane %v1084_v56, 2  ;;  %v1474_v58 = vpop.f32.mrb[9].mxu0 }
0x144f   :  { %v1091_v59 = vadd.f32 %v1089_v57, %v1942_v37  ;;  %v1100_v37 = vrot.slane %v996_v50, 6 }
0x1451   :  { %1618 = vtanh.f32 %v1091_v59  ;;  %v1320_v61 = vmul.f32 -1.442695, %v1091_v59 }
0x1453   :  { %1620 = vpow2.f32 %v1320_v61 }
0x145b   :  { %v1619_v60 = vpop.eup %1618 }
0x145c   :  { %1104 = vrot.lane.b32.xlu1 %v1619_v60, %s1714_s24 }
0x145d   :  { %v1621_v62 = vpop.eup %1620 }
0x145e   :  { %v1095_v63 = vadd.f32 1.0, %v1621_v62 }
0x1460   :  { %1622 = vrcp.f32 %v1095_v63 }
0x146a   :  { %v1623_v0 = vpop.eup %1622 }
0x146b   :  { %v1102_v3 = vmul.f32 %v1623_v0, %v1100_v37 }
0x14ce   :  { %v1105_v1 = vpop.permute.xlu1 %1104 }
0x14cf   :  { %v1107_v2 = vmul.f32 %v1623_v0, %v1105_v1 }
0x14d1   :  { %1109 = vrot.lane.b32.xlu0 %v1107_v2, %s1715_s16 }
0x14d5   :  { %424 = vrot.lane.b32.xlu0 %v1968_v14, %s1715_s16 }
0x14d9   :  { %660 = vrot.lane.b32.xlu0 %v1998_v55, %s1715_s16 }
0x14dd   :  { %1004 = vrot.lane.b32.xlu0 %v1002_v53, %s1715_s16 }
0x1543   :  { %v1110_v5 = vpop.permute.xlu0 %1109 }
0x1544   :  { %v1112_v6 = vadd.f32 %v1110_v5, %v1102_v3 }
0x1546   :  { %1624 = vtanh.f32 %v1112_v6  ;;  %1128 = vrot.lane.b32.xlu0 %v1112_v6, %s1716_s4 }
0x1547   :  { %v425_v7 = vpop.permute.xlu0 %424 }
0x1548   :  { %428 = vst.msk [vmem:[#allocation3 - $0x1] sm:$0x4] %vm427_vm4, %v425_v7 }
0x1549   :  { %430 = vst.msk [vmem:[#allocation3 + $0x6] sm:$0x8] %vm429_vm5, %v425_v7 }
0x154b   :  { %v661_v14 = vpop.permute.xlu0 %660 }
0x154c   :  { %664 = vst.msk [vmem:[#allocation3 - $0x3] sm:$0x40] %vm663_vm6, %v661_v14 }
0x154d   :  { %666 = vst.msk [vmem:[#allocation3 + $0x4] sm:$0x80] %vm665_vm7, %v661_v14 }
0x154f   :  { %v1005_v55 = vpop.permute.xlu0 %1004 }
0x1550   :  { %v1625_v9 = vpop.eup %1624  ;;  %1007 = vst.msk [vmem:[#allocation3 + $0x2] sm:$0x10] %vm545_vm8, %v1005_v55 }
0x1551   :  { %1008 = vst.msk [vmem:[#allocation3 + $0x9] sm:$0x20] %vm547_vm9, %v1005_v55  ;;  %1115 = vrot.lane.b32.xlu1 %v1625_v9, %s1714_s24 }
0x1555   :  { %542 = vrot.lane.b32.xlu1 %v1983_v34, %s1715_s16  ;;  %v1136_v34 = vld [vmem:[%s2122_s5 + $0x10] sm:$0xff]  ;;  %s1717_s5 = smov [#allocation8]  }
0x1556   :  { %v1546_v18 = vpack.c.bf16 %v1137_v17, %v1136_v34  ;;  %s1246_s27 = sshll.u32 %s1717_s5, 4  ;;  %s1247_s27 = int_to_ptr.vmem [resolvable:$true] %s1246_s27 }
0x1557   :  { %s1638_s20 = scalar_lea.vmem %s1247_s27, 32  ;;  %p1643_p6 = scmp.lt.s32.totalorder %s1247_s27, %s1247_s27 }
0x1558   :  { %1547 = vmatprep.subr.bf16.mxu1 %v1546_v18  ;;  %p1639_p5 = scmp.ne.s32.totalorder %s1247_s27, %s1638_s20  ;;  %p1644_p7 = scmp.lt.s32.totalorder %s1638_s20, %s1638_s20 }
0x1559   :  { %888 = vrot.lane.b32.xlu1 %v2025_v30, %s1715_s16  ;;  %1549 = vmatpush3.bf16.msra.mxu1 %v1546_v18 }
0x155a   :  { %p1645_p8 = por %p1644_p7, %p1643_p6 }
0x155c   :  { %p1646_p9 = pnand %p1645_p8, %p1639_p5 }
0x15b8   :  { %v1129_v15 = vpop.permute.xlu0 %1128 }
0x15b9   :  { %1131 = vst.msk [vmem:[#allocation10 - $0x6] sm:$0xc0] %vm1125_vm10, %v1129_v15 }
0x15c3   :  { %v1116_v19 = vpop.permute.xlu1 %1115 }
0x15c4   :  { %v1118_v20 = vmul.f32 %v1623_v0, %v1116_v19 }
0x15c6   :  { %1120 = vrot.lane.b32.xlu1 %v1118_v20, %s1715_s16 }
0x15c7   :  { %v543_v21 = vpop.permute.xlu1 %542 }
0x15c8   :  { %546 = vst.msk [vmem:[#allocation3 - $0x2] sm:$0x10] %vm545_vm8, %v543_v21 }
0x15c9   :  { %548 = vst.msk [vmem:[#allocation3 + $0x5] sm:$0x20] %vm547_vm9, %v543_v21 }
0x15cb   :  { %v889_v22 = vpop.permute.xlu1 %888 }
0x15cc   :  { %891 = vst.msk [vmem:[#allocation3 + $0x3] sm:$0x4] %vm427_vm4, %v889_v22 }
0x15cd   :  { %892 = vst.msk [vmem:[#allocation3 + $0xa] sm:$0x8] %vm429_vm5, %v889_v22 }
0x1638   :  { %v1121_v23 = vpop.permute.xlu1 %1120 }
0x1639   :  { %1123 = vst.msk [vmem:[#allocation3 + $0x1] sm:$0x40] %vm663_vm6, %v1121_v23 }
0x163a   :  { %1124 = vst.msk [vmem:[#allocation3 + $0x8] sm:$0x80] %vm665_vm7, %v1121_v23 }
0x163b   :  { %1126 = vst.msk [vmem:[#allocation8 - $0x6] sm:$0xc0] %vm1125_vm10, %v1121_v23 }
0x1640   :  { %v1132_v8 = vld [vmem:[#allocation3] sm:$0xff] }
0x1641   :  { %v1133_v24 = vld [vmem:[#allocation3 + $0x8] sm:$0xff]  ;;  %1483 = vmatprep.mubr.msk.f32.mxu1 %vm119_vm2, %v1132_v8 }
0x1642   :  { %1484 = vmatmul.mubr.msk.f32.vlgmr.msra.gmra.mrb[8].mxu1 %vm119_vm2, %v1133_v24 }
0x1643   :  { %1649 = shalt.err (!%p1646_p9)
}
0x1644   :  { %s1650_s19 = scalar_lea.hbm %s2127_s10, 32 }
0x1645   :  { %p1651_p10 = scmp.ne.s32.totalorder %s2127_s10, %s1650_s19  ;;  %p1654_p11 = scmp.lt.u32.totalorder %s1650_s19, %s2127_s10 }
0x1647   :  { %p1656_p12 = pnand %p1654_p11, %p1651_p10 }
0x1649   :  { %1659 = shalt.err (!%p1656_p12)
}
0x164a   :  { %1249 = dma.vmem_to_hbm [thread:$0]  %s1247_s27, 32, %s2127_s10, [#allocation9]  }
0x164b   :  { %s1718_s1 = smov [#allocation10]  }
0x164c   :  { %s1256_s23 = sshll.u32 %s1718_s1, 4  ;;  %s1257_s23 = int_to_ptr.vmem [resolvable:$true] %s1256_s23 }
0x164d   :  { %s1660_s24 = scalar_lea.vmem %s1257_s23, 32  ;;  %p1665_p0 = scmp.lt.s32.totalorder %s1257_s23, %s1257_s23 }
0x164e   :  { %p1661_p13 = scmp.ne.s32.totalorder %s1257_s23, %s1660_s24  ;;  %p1666_p1 = scmp.lt.s32.totalorder %s1660_s24, %s1660_s24 }
0x1650   :  { %p1667_p2 = por %p1666_p1, %p1665_p0 }
0x1652   :  { %p1668_p3 = pnand %p1667_p2, %p1661_p13 }
0x1654   :  { %1671 = shalt.err (!%p1668_p3)
}
0x1655   :  { %s1672_s16 = scalar_lea.hbm %s2128_s11, 32 }
0x1656   :  { %p1673_p4 = scmp.ne.s32.totalorder %s2128_s11, %s1672_s16  ;;  %p1676_p5 = scmp.lt.u32.totalorder %s1672_s16, %s2128_s11 }
0x1658   :  { %p1678_p6 = pnand %p1676_p5, %p1673_p4 }
0x165a   :  { %1681 = shalt.err (!%p1678_p6)
}
0x165b   :  { %1259 = dma.vmem_to_hbm [thread:$0]  %s1257_s23, 32, %s2128_s11, [#allocation9]   ;;  %v1321_v13 = vld [vmem:[%s2123_s6] ss:$0 sm:$0xff] }
0x165c   :  { %s1719_s17 = smov [#allocation6]  }
0x165d   :  { %s1233_s7 = sshll.u32 %s1719_s17, 4  ;;  %s1234_s7 = int_to_ptr.vmem [resolvable:$true] %s1233_s7 }
0x165e   :  { %s1682_s5 = scalar_lea.vmem %s1234_s7, 256  ;;  %p1687_p8 = scmp.lt.s32.totalorder %s1234_s7, %s1234_s7 }
0x165f   :  { %p1683_p7 = scmp.ne.s32.totalorder %s1234_s7, %s1682_s5  ;;  %p1688_p9 = scmp.lt.s32.totalorder %s1682_s5, %s1682_s5 }
0x1661   :  { %p1689_p10 = por %p1688_p9, %p1687_p8 }
0x1663   :  { %p1690_p11 = pnand %p1689_p10, %p1683_p7 }
0x1715   :  { %v1485_v25 = vpop.f32.mrb[8].mxu1 }
0x1716   :  { %v1223_v4 = vadd.f32 %v1485_v25, %v1321_v13  ;;  %v1217_v12 = vpop.f32.mrb[9].mxu1 }
0x1717   :  { %v1218_v26 = vadd.f32 %v1321_v13, %v1217_v12 }
0x1718   :  { %1227 = vst [vmem:[#allocation6 + $0x8] sm:$0xff] %v1223_v4 }
0x1719   :  { %1226 = vst [vmem:[#allocation6] sm:$0xff] %v1218_v26 }
0x171a   :  { %1693 = shalt.err (!%p1690_p11)
}
0x171b   :  { %s1694_s6 = scalar_lea.hbm %s2126_s9, 256 }
0x171c   :  { %p1695_p12 = scmp.ne.s32.totalorder %s2126_s9, %s1694_s6  ;;  %p1698_p13 = scmp.lt.u32.totalorder %s1694_s6, %s2126_s9 }
0x171e   :  { %p1700_p0 = pnand %p1698_p13, %p1695_p12 }
0x1720   :  { %1703 = shalt.err (!%p1700_p0)
}
0x1721   :  { %s1720_s2 = smov 128   ;;  %s1721_s21 = smov 8  }
0x1722   :  { %1239 = dma.vmem_to_hbm [thread:$0]  %s1234_s7, 256, %s2126_s9, [#allocation7], %s1720_s2, %s1720_s2, %s1721_s21  }
0x1723   :  { %1706 = dma.done.wait [#allocation7], 256  }
0x1724   :  { %1707 = vsyncadd [#allocation7], 4294967040 }
0x1725   :  { %1708 = dma.done.wait [#allocation9], 64  }
0x1726   :  { %1709 = vsyncadd [#allocation9], 4294967232 }
0x1727   :  { %1269 = vsyncpa [#allocation7], 1 }
0x1728   :  { %1270 = vsyncpa [#allocation9], 1 }

</bundles_post_ra>
